<compile_context>
chip_gen: v6e
topology: v6e:2x2x1
jax: 0.10.0
libtpu: 0.0.40
codegen_flags: <defaults>
</compile_context>

<pallas_src>
import jax
import jax.numpy as jnp
from jax.experimental import pallas as pl
from jax.experimental.pallas import tpu as pltpu


# ----------------------------- configuration -----------------------------
TASK_NUM     = 2     # args.task_num
BATCH        = 2     # shots per task
FEAT_DIM     = 16    # image feature dim fed to mapper_net
PREFIX_LEN   = 4     # args.prefix_length
SEQ_LEN      = 8     # args.seq_len   (question)
SEQ_LEN_A    = 8     # args.seq_len_a (answer)
EMB_D        = 32    # gpt embedding dim
VOCAB        = 128   # gpt vocab size
UPDATE_STEP  = 3     # args.update_step
UPDATE_LR    = 0.1   # args.update_lr
PAD_TOKEN_ID = VOCAB - 1  # gpt_tokenizer.eos_token_id

N_Q   = TASK_NUM * BATCH * SEQ_LEN_A   # query answer-logit rows (all tasks)
N_S   = TASK_NUM * BATCH * SEQ_LEN_A   # support answer-logit rows (all tasks)
N_ALL = N_Q + N_S                      # stacked [query ; support]
TF    = TASK_NUM * FEAT_DIM            # block-diagonal feature columns
NSLOT = UPDATE_STEP + 1                # loss / correctness slots
OUT_LANES = 128
INNER_LR  = UPDATE_LR / PREFIX_LEN     # dW = broadcast(dW_avg) / PREFIX_LEN


# ------------------------------ fused kernel ------------------------------
def _maml_kernel(w0_ref, xexp_ref, xst_ref, et_ref, emb_ref, bias_ref,
                 oh_ref, rw_ref, kcq_ref, tqf_ref, out_ref):
    f32 = jnp.float32

    x_exp = xexp_ref[...]      # (N_ALL, TF)  block-diag, row-expanded [qry; spt]
    xst   = xst_ref[...]       # (TF, N_S)    support block, transposed
    et    = et_ref[...]        # (D, V)       E^T (LM head)
    emb   = emb_ref[...]       # (V, D)       E   (dlogits backward)
    bias  = bias_ref[...]      # (N_ALL, V)   positional + pooled-question logits bias
    oh    = oh_ref[...]        # (N_ALL, V)   one-hot answer targets
    rw    = rw_ref[...]        # (N_ALL, 1)   CE row weight (mask*!pad / per-task cnt)
    kcq   = kcq_ref[...]       # (N_Q, 1)     query correctness mask (mask only)
    tqf   = tqf_ref[...]       # (N_Q, 1)     query targets as f32

    oh_q, oh_s = oh[:N_Q], oh[N_Q:]
    wq,   ws   = rw[:N_Q], rw[N_Q:]
    col = jax.lax.broadcasted_iota(jnp.int32, (N_Q, VOCAB), 1).astype(f32)

    def step(w_block, need_grad):
        # Shared forward: query eval (slot k) + this step's support gradient
        # both evaluate the model at the same fast weight w_block.
        h      = jnp.dot(x_exp, w_block, preferred_element_type=f32)   # (N_ALL, D)
        logits = jnp.dot(h, et, preferred_element_type=f32) + bias     # (N_ALL, V)

        # ---- query loss + correctness (rows :N_Q) ----
        lq  = logits[:N_Q]
        mq  = jnp.max(lq, axis=-1, keepdims=True)
        lse = jnp.log(jnp.sum(jnp.exp(lq - mq), axis=-1, keepdims=True)) + mq
        tgt = jnp.sum(oh_q * lq, axis=-1, keepdims=True)
        loss = jnp.sum((lse - tgt) * wq)        # per-task CE means, summed over tasks
        # argmax (first max, reusing the softmax row max)
        pred = jnp.min(jnp.where(lq >= mq, col, float(VOCAB)),
                       axis=-1, keepdims=True)
        corr = jnp.sum(jnp.logical_and(pred == tqf, kcq > 0.0).astype(f32))

        if not need_grad:
            return loss, corr, None

        # ---- support gradient (rows N_Q:) ----
        ls  = logits[N_Q:]
        ms  = jnp.max(ls, axis=-1, keepdims=True)
        ezs = jnp.exp(ls - ms)
        p   = ezs / jnp.sum(ezs, axis=-1, keepdims=True)   # exact divide (grad fidelity)
        dlog = (p - oh_s) * ws                              # (N_S, V)
        dh   = jnp.dot(dlog, emb, preferred_element_type=f32)   # (N_S, D)
        grad = jnp.dot(xst, dh, preferred_element_type=f32)     # (TF, D) per-task grads
        return loss, corr, grad

    def store_slot(k, loss, corr):
        out_ref[pl.ds(k, 1), :] = jnp.broadcast_to(
            loss.reshape(1, 1), (1, OUT_LANES))
        out_ref[pl.ds(NSLOT + k, 1), :] = jnp.broadcast_to(
            corr.reshape(1, 1), (1, OUT_LANES))

    # stacked per-task fast weights live in vregs across the whole inner loop
    w = w0_ref[...]                              # (TF, D)
    for k in range(UPDATE_STEP):
        loss, corr, grad = step(w, True)
        store_slot(k, loss, corr)                # slot k: eval at w_k
        w = w - INNER_LR * grad                  # w_{k+1}
    loss, corr, _ = step(w, False)               # final slot: eval only
    store_slot(UPDATE_STEP, loss, corr)


# ------------------------------- spec helper --------------------------------
def _vspec(shape):
    return pl.BlockSpec(shape, lambda i, _n=len(shape): (0,) * _n)


# --------------------------- MetaTrainer.forward ---------------------------
@jax.jit
def meta_trainer_forward(w_map0, frozen, batch):
    (x_spt, y_spt_q, y_spt_a, y_spt_mask_q, y_spt_mask_a,
     x_qry, y_qry_q, y_qry_a, y_qry_mask_q, y_qry_mask_a) = batch

    f32 = jnp.float32
    E, Ppos = frozen["E"], frozen["Ppos"]
    et = E.T                                               # (D, V)
    pos_bias = jnp.dot(Ppos, et)                           # (A, V)

    # The model only ever consumes the prefix-mean of the mapper weight.
    w_avg0   = jnp.mean(w_map0.reshape(FEAT_DIM, PREFIX_LEN, EMB_D), axis=1)
    w_block0 = jnp.tile(w_avg0, (TASK_NUM, 1))             # (TF, D)

    def pool_question(q_tokens, mask_q):
        q_emb = jnp.take(E, q_tokens, axis=0)                           # (T,B,S,D)
        mq = mask_q[:, :, PREFIX_LEN:].astype(f32)                      # (T,B,S)
        denom = jnp.maximum(jnp.sum(mq, axis=-1, keepdims=True), 1.0)
        return jnp.sum(q_emb * mq[..., None], axis=2) / denom           # (T,B,D)

    def logits_bias(q_tokens, mask_q):
        # fast-weight-independent part of the logits, per answer row
        qb = jnp.dot(pool_question(q_tokens, mask_q), et)               # (T,B,V)
        b = qb[:, :, None, :] + pos_bias[None, None, :, :]              # (T,B,A,V)
        return b.reshape(-1, VOCAB)

    eye_t = jnp.eye(TASK_NUM, dtype=f32)

    def expand_block(x):       # (T,B,F) -> (T*B*A, T*F) block-diag, row-expanded
        xb = x[:, :, None, :] * eye_t[:, None, :, None]                 # (T,B,T,F)
        xe = jnp.broadcast_to(xb[:, :, None, :, :],
                              (TASK_NUM, BATCH, SEQ_LEN_A, TASK_NUM, FEAT_DIM))
        return xe.reshape(TASK_NUM * BATCH * SEQ_LEN_A, TF)

    def row_data(a_tokens, mask_a):
        t = a_tokens.reshape(TASK_NUM, BATCH * SEQ_LEN_A).astype(jnp.int32)
        m = mask_a[:, :, PREFIX_LEN:].reshape(TASK_NUM, BATCH * SEQ_LEN_A)
        m = m.astype(f32)
        keep = m * (t != PAD_TOKEN_ID).astype(f32)          # CE ignore_index folded
        cnt = jnp.maximum(jnp.sum(keep, axis=1, keepdims=True), 1.0)
        w = (keep / cnt).reshape(-1, 1)                     # per-task CE mean folded
        onehot = jax.nn.one_hot(t.reshape(-1), VOCAB, dtype=f32)
        return t.reshape(-1), w, m.reshape(-1, 1), onehot

    _,  ws_w, _,       oh_s = row_data(y_spt_a, y_spt_mask_a)
    tq, wq_w, kcq_col, oh_q = row_data(y_qry_a, y_qry_mask_a)  # corr uses mask only

    x_exp_q = expand_block(x_qry)
    x_exp_s = expand_block(x_spt)
    x_exp   = jnp.concatenate([x_exp_q, x_exp_s], axis=0)      # (N_ALL, TF)
    xst     = x_exp_s.T                                        # (TF, N_S)

    bias_all = jnp.concatenate([logits_bias(y_qry_q, y_qry_mask_q),
                                logits_bias(y_spt_q, y_spt_mask_q)], axis=0)
    oh_all   = jnp.concatenate([oh_q, oh_s], axis=0)
    rw_all   = jnp.concatenate([wq_w, ws_w], axis=0)
    tqf      = tq.astype(f32).reshape(-1, 1)

    out = pl.pallas_call(
        _maml_kernel,
        out_shape=jax.ShapeDtypeStruct((2 * NSLOT, OUT_LANES), f32),
        grid=(1,),
        in_specs=[
            _vspec((TF, EMB_D)),        # w_block0
            _vspec((N_ALL, TF)),        # x_exp
            _vspec((TF, N_S)),          # x_exp_s^T
            _vspec((EMB_D, VOCAB)),     # E^T
            _vspec((VOCAB, EMB_D)),     # E
            _vspec((N_ALL, VOCAB)),     # logits bias
            _vspec((N_ALL, VOCAB)),     # one-hot targets
            _vspec((N_ALL, 1)),         # CE row weights
            _vspec((N_Q, 1)),           # query correctness mask
            _vspec((N_Q, 1)),           # query targets (f32)
        ],
        out_specs=_vspec((2 * NSLOT, OUT_LANES)),
        compiler_params=pltpu.CompilerParams(
            dimension_semantics=("arbitrary",)),
    )(w_block0, x_exp, xst, et, E, bias_all, oh_all, rw_all, kcq_col, tqf)

    losses_q = out[:NSLOT, 0]                 # per-slot, already summed over tasks
    corrects = out[NSLOT:2 * NSLOT, 0]

    a_seq_len = jnp.sum(y_qry_mask_a[:, :, PREFIX_LEN:].astype(f32))
    accs = corrects / jnp.maximum(a_seq_len, 1.0)
    # TODO(synk): outer AdamW meta-update + clip_grad_norm_ (optimizer-state
    # mutation on loss_q = mean(losses_q[2:]) / task_num) has no clean Pallas
    # equivalent and does not affect the returned (accs, losses) values.
    return accs, losses_q


# --------------------------------- main ------------------------------------
if __name__ == "__main__":
    key = jax.random.PRNGKey(0)
    keys = jax.random.split(key, 16)

    # deterministic parameter init (shapes implied by the module's __init__)
    w_map = 0.05 * jax.random.normal(keys[0], (FEAT_DIM, PREFIX_LEN * EMB_D),
                                     jnp.float32)
    frozen = {
        "E":    0.05 * jax.random.normal(keys[1], (VOCAB, EMB_D), jnp.float32),
        "Ppos": 0.05 * jax.random.normal(keys[2], (SEQ_LEN_A, EMB_D),
                                         jnp.float32),
    }

    def rand_tokens(k, shape):
        return jax.random.randint(k, shape, 0, VOCAB - 1, jnp.int32)

    def rand_mask(k, shape):
        m = (jax.random.uniform(k, shape) < 0.8).astype(jnp.float32)
        # guarantee at least one active answer/question position per row
        return m.at[..., PREFIX_LEN].set(1.0)

    x_spt = jax.random.normal(keys[3], (TASK_NUM, BATCH, FEAT_DIM), jnp.float32)
    x_qry = jax.random.normal(keys[4], (TASK_NUM, BATCH, FEAT_DIM), jnp.float32)
    y_spt_q = rand_tokens(keys[5], (TASK_NUM, BATCH, SEQ_LEN))
    y_qry_q = rand_tokens(keys[6], (TASK_NUM, BATCH, SEQ_LEN))
    y_spt_a = rand_tokens(keys[7], (TASK_NUM, BATCH, SEQ_LEN_A))
    y_qry_a = rand_tokens(keys[8], (TASK_NUM, BATCH, SEQ_LEN_A))
    y_spt_mask_q = rand_mask(keys[9],  (TASK_NUM, BATCH, PREFIX_LEN + SEQ_LEN))
    y_qry_mask_q = rand_mask(keys[10], (TASK_NUM, BATCH, PREFIX_LEN + SEQ_LEN))
    y_spt_mask_a = rand_mask(keys[11], (TASK_NUM, BATCH, PREFIX_LEN + SEQ_LEN_A))
    y_qry_mask_a = rand_mask(keys[12], (TASK_NUM, BATCH, PREFIX_LEN + SEQ_LEN_A))

    batch = (x_spt, y_spt_q, y_spt_a, y_spt_mask_q, y_spt_mask_a,
             x_qry, y_qry_q, y_qry_a, y_qry_mask_q, y_qry_mask_a)

    accs, losses_q = meta_trainer_forward(w_map, frozen, batch)
    jax.block_until_ready((accs, losses_q))

    assert accs.shape == (UPDATE_STEP + 1,)
    assert losses_q.shape == (UPDATE_STEP + 1,)
    assert bool(jnp.all(jnp.isfinite(accs))) and bool(jnp.all(jnp.isfinite(losses_q)))
    print("KERNEL_OK")
</pallas_src>

<mosaic_0001>
module attributes {stable_mosaic.version = 11 : i64} {
  func.func @_maml_kernel(%arg0: i32, %arg1: memref<32x32xf32, #tpu.memory_space<vmem>>, %arg2: memref<64x32xf32, #tpu.memory_space<vmem>>, %arg3: memref<32x32xf32, #tpu.memory_space<vmem>>, %arg4: memref<32x128xf32, #tpu.memory_space<vmem>>, %arg5: memref<128x32xf32, #tpu.memory_space<vmem>>, %arg6: memref<64x128xf32, #tpu.memory_space<vmem>>, %arg7: memref<64x128xf32, #tpu.memory_space<vmem>>, %arg8: memref<64x1xf32, #tpu.memory_space<vmem>>, %arg9: memref<32x1xf32, #tpu.memory_space<vmem>>, %arg10: memref<32x1xf32, #tpu.memory_space<vmem>>, %arg11: memref<8x128xf32, #tpu.memory_space<vmem>>) attributes {dimension_semantics = [#tpu.dimension_semantics<arbitrary>], iteration_bounds = array<i64: 1>, scalar_prefetch = 0 : i64, scratch_operands = 0 : i64, tpu.core_type = #tpu.core_type<tc>, window_params = [{pipeline_mode = #tpu.pipeline_mode<synchronous>, transform_indices = @transform_0, window_bounds = array<i64: 32, 32>}, {pipeline_mode = #tpu.pipeline_mode<synchronous>, transform_indices = @transform_1, window_bounds = array<i64: 64, 32>}, {pipeline_mode = #tpu.pipeline_mode<synchronous>, transform_indices = @transform_2, window_bounds = array<i64: 32, 32>}, {pipeline_mode = #tpu.pipeline_mode<synchronous>, transform_indices = @transform_3, window_bounds = array<i64: 32, 128>}, {pipeline_mode = #tpu.pipeline_mode<synchronous>, transform_indices = @transform_4, window_bounds = array<i64: 128, 32>}, {pipeline_mode = #tpu.pipeline_mode<synchronous>, transform_indices = @transform_5, window_bounds = array<i64: 64, 128>}, {pipeline_mode = #tpu.pipeline_mode<synchronous>, transform_indices = @transform_6, window_bounds = array<i64: 64, 128>}, {pipeline_mode = #tpu.pipeline_mode<synchronous>, transform_indices = @transform_7, window_bounds = array<i64: 64, 1>}, {pipeline_mode = #tpu.pipeline_mode<synchronous>, transform_indices = @transform_8, window_bounds = array<i64: 32, 1>}, {pipeline_mode = #tpu.pipeline_mode<synchronous>, transform_indices = @transform_9, window_bounds = array<i64: 32, 1>}, {pipeline_mode = #tpu.pipeline_mode<synchronous>, transform_indices = @transform_10, window_bounds = array<i64: 8, 128>}]} {
    %c0 = arith.constant 0 : index
    %c0_0 = arith.constant 0 : index
    %0 = vector.load %arg2[%c0, %c0_0] : memref<64x32xf32, #tpu.memory_space<vmem>>, vector<64x32xf32>
    %c0_1 = arith.constant 0 : index
    %c0_2 = arith.constant 0 : index
    %1 = vector.load %arg3[%c0_1, %c0_2] : memref<32x32xf32, #tpu.memory_space<vmem>>, vector<32x32xf32>
    %c0_3 = arith.constant 0 : index
    %c0_4 = arith.constant 0 : index
    %2 = vector.load %arg4[%c0_3, %c0_4] : memref<32x128xf32, #tpu.memory_space<vmem>>, vector<32x128xf32>
    %c0_5 = arith.constant 0 : index
    %c0_6 = arith.constant 0 : index
    %3 = vector.load %arg5[%c0_5, %c0_6] : memref<128x32xf32, #tpu.memory_space<vmem>>, vector<128x32xf32>
    %c0_7 = arith.constant 0 : index
    %c0_8 = arith.constant 0 : index
    %4 = vector.load %arg6[%c0_7, %c0_8] : memref<64x128xf32, #tpu.memory_space<vmem>>, vector<64x128xf32>
    %c0_9 = arith.constant 0 : index
    %c0_10 = arith.constant 0 : index
    %5 = vector.load %arg7[%c0_9, %c0_10] : memref<64x128xf32, #tpu.memory_space<vmem>>, vector<64x128xf32>
    %c0_11 = arith.constant 0 : index
    %c0_12 = arith.constant 0 : index
    %6 = vector.load %arg8[%c0_11, %c0_12] : memref<64x1xf32, #tpu.memory_space<vmem>>, vector<64x1xf32>
    %c0_13 = arith.constant 0 : index
    %c0_14 = arith.constant 0 : index
    %7 = vector.load %arg9[%c0_13, %c0_14] : memref<32x1xf32, #tpu.memory_space<vmem>>, vector<32x1xf32>
    %c0_15 = arith.constant 0 : index
    %c0_16 = arith.constant 0 : index
    %8 = vector.load %arg10[%c0_15, %c0_16] : memref<32x1xf32, #tpu.memory_space<vmem>>, vector<32x1xf32>
    %9 = vector.extract_strided_slice %5 {offsets = [0, 0], sizes = [32, 128], strides = [1, 1]} : vector<64x128xf32> to vector<32x128xf32>
    %10 = vector.extract_strided_slice %5 {offsets = [32, 0], sizes = [32, 128], strides = [1, 1]} : vector<64x128xf32> to vector<32x128xf32>
    %11 = vector.extract_strided_slice %6 {offsets = [0, 0], sizes = [32, 1], strides = [1, 1]} : vector<64x1xf32> to vector<32x1xf32>
    %12 = vector.extract_strided_slice %6 {offsets = [32, 0], sizes = [32, 1], strides = [1, 1]} : vector<64x1xf32> to vector<32x1xf32>
    %13 = tpu.iota {dimensions = array<i32: 1>} : vector<32x128xi32>
    %14 = arith.sitofp %13 : vector<32x128xi32> to vector<32x128xf32>
    %c0_17 = arith.constant 0 : index
    %c0_18 = arith.constant 0 : index
    %15 = vector.load %arg1[%c0_17, %c0_18] : memref<32x32xf32, #tpu.memory_space<vmem>>, vector<32x32xf32>
    %cst = arith.constant dense<0.000000e+00> : vector<64x32xf32>
    %16 = tpu.matmul %0, %15, %cst {dimension_numbers = #tpu.dot_dimension_numbers<[1], [0], [0], [1], [0, 0, 1, 1], [], []>} : vector<64x32xf32>, vector<32x32xf32>, vector<64x32xf32> -> vector<64x32xf32>
    %cst_19 = arith.constant dense<0.000000e+00> : vector<64x128xf32>
    %17 = tpu.matmul %16, %2, %cst_19 {dimension_numbers = #tpu.dot_dimension_numbers<[1], [0], [0], [1], [0, 0, 1, 1], [], []>} : vector<64x32xf32>, vector<32x128xf32>, vector<64x128xf32> -> vector<64x128xf32>
    %18 = arith.addf %17, %4 : vector<64x128xf32>
    %19 = vector.extract_strided_slice %18 {offsets = [0, 0], sizes = [32, 128], strides = [1, 1]} : vector<64x128xf32> to vector<32x128xf32>
    %cst_20 = arith.constant dense<0xFF800000> : vector<32xf32>
    %20 = vector.multi_reduction <maximumf>, %19, %cst_20 [1] : vector<32x128xf32> to vector<32xf32>
    %21 = vector.shape_cast %20 : vector<32xf32> to vector<32x1xf32>
    %22 = vector.broadcast %21 : vector<32x1xf32> to vector<32x128xf32>
    %23 = arith.subf %19, %22 : vector<32x128xf32>
    %24 = math.exp %23 : vector<32x128xf32>
    %cst_21 = arith.constant dense<0.000000e+00> : vector<32xf32>
    %25 = vector.multi_reduction <add>, %24, %cst_21 [1] : vector<32x128xf32> to vector<32xf32>
    %26 = vector.shape_cast %25 : vector<32xf32> to vector<32x1xf32>
    %27 = math.log %26 : vector<32x1xf32>
    %28 = arith.addf %27, %21 : vector<32x1xf32>
    %29 = arith.mulf %9, %19 : vector<32x128xf32>
    %cst_22 = arith.constant dense<0.000000e+00> : vector<32xf32>
    %30 = vector.multi_reduction <add>, %29, %cst_22 [1] : vector<32x128xf32> to vector<32xf32>
    %31 = vector.shape_cast %30 : vector<32xf32> to vector<32x1xf32>
    %32 = arith.subf %28, %31 : vector<32x1xf32>
    %33 = arith.mulf %32, %11 : vector<32x1xf32>
    %34 = vector.shape_cast %33 : vector<32x1xf32> to vector<1x32x1xf32>
    %cst_23 = arith.constant dense<0.000000e+00> : vector<1xf32>
    %35 = vector.multi_reduction <add>, %34, %cst_23 [1, 2] : vector<1x32x1xf32> to vector<1xf32>
    %36 = vector.shape_cast %35 : vector<1xf32> to vector<1x1x1xf32>
    %37 = vector.extract %36[0, 0, 0] : f32 from vector<1x1x1xf32>
    %38 = vector.broadcast %21 : vector<32x1xf32> to vector<32x128xf32>
    %39 = arith.cmpf oge, %19, %38 : vector<32x128xf32>
    %cst_24 = arith.constant 1.280000e+02 : f32
    %40 = vector.broadcast %cst_24 : f32 to vector<32x128xf32>
    %41 = arith.select %39, %14, %40 : vector<32x128xi1>, vector<32x128xf32>
    %cst_25 = arith.constant dense<0x7F800000> : vector<32xf32>
    %42 = vector.multi_reduction <minimumf>, %41, %cst_25 [1] : vector<32x128xf32> to vector<32xf32>
    %43 = vector.shape_cast %42 : vector<32xf32> to vector<32x1xf32>
    %44 = arith.cmpf oeq, %43, %8 : vector<32x1xf32>
    %cst_26 = arith.constant 0.000000e+00 : f32
    %45 = vector.broadcast %cst_26 : f32 to vector<32x1xf32>
    %46 = arith.cmpf ogt, %7, %45 : vector<32x1xf32>
    %47 = arith.andi %44, %46 : vector<32x1xi1>
    %48 = arith.extui %47 : vector<32x1xi1> to vector<32x1xi32>
    %49 = arith.sitofp %48 : vector<32x1xi32> to vector<32x1xf32>
    %50 = vector.shape_cast %49 : vector<32x1xf32> to vector<1x32x1xf32>
    %cst_27 = arith.constant dense<0.000000e+00> : vector<1xf32>
    %51 = vector.multi_reduction <add>, %50, %cst_27 [1, 2] : vector<1x32x1xf32> to vector<1xf32>
    %52 = vector.shape_cast %51 : vector<1xf32> to vector<1x1x1xf32>
    %53 = vector.extract %52[0, 0, 0] : f32 from vector<1x1x1xf32>
    %54 = vector.extract_strided_slice %18 {offsets = [32, 0], sizes = [32, 128], strides = [1, 1]} : vector<64x128xf32> to vector<32x128xf32>
    %cst_28 = arith.constant dense<0xFF800000> : vector<32xf32>
    %55 = vector.multi_reduction <maximumf>, %54, %cst_28 [1] : vector<32x128xf32> to vector<32xf32>
    %56 = vector.shape_cast %55 : vector<32xf32> to vector<32x1xf32>
    %57 = vector.broadcast %56 : vector<32x1xf32> to vector<32x128xf32>
    %58 = arith.subf %54, %57 : vector<32x128xf32>
    %59 = math.exp %58 : vector<32x128xf32>
    %cst_29 = arith.constant dense<0.000000e+00> : vector<32xf32>
    %60 = vector.multi_reduction <add>, %59, %cst_29 [1] : vector<32x128xf32> to vector<32xf32>
    %61 = vector.shape_cast %60 : vector<32xf32> to vector<32x1xf32>
    %62 = vector.broadcast %61 : vector<32x1xf32> to vector<32x128xf32>
    %63 = arith.divf %59, %62 : vector<32x128xf32>
    %64 = arith.subf %63, %10 : vector<32x128xf32>
    %65 = vector.broadcast %12 : vector<32x1xf32> to vector<32x128xf32>
    %66 = arith.mulf %64, %65 : vector<32x128xf32>
    %cst_30 = arith.constant dense<0.000000e+00> : vector<32x32xf32>
    %67 = tpu.matmul %66, %3, %cst_30 {dimension_numbers = #tpu.dot_dimension_numbers<[1], [0], [0], [1], [0, 0, 1, 1], [], []>} : vector<32x128xf32>, vector<128x32xf32>, vector<32x32xf32> -> vector<32x32xf32>
    %cst_31 = arith.constant dense<0.000000e+00> : vector<32x32xf32>
    %68 = tpu.matmul %1, %67, %cst_31 {dimension_numbers = #tpu.dot_dimension_numbers<[1], [0], [0], [1], [0, 0, 1, 1], [], []>} : vector<32x32xf32>, vector<32x32xf32>, vector<32x32xf32> -> vector<32x32xf32>
    %69 = vector.broadcast %37 : f32 to vector<1x1xf32>
    %70 = vector.shape_cast %69 : vector<1x1xf32> to vector<1x1xf32>
    %71 = vector.broadcast %70 : vector<1x1xf32> to vector<1x128xf32>
    %c0_32 = arith.constant 0 : index
    %c0_33 = arith.constant 0 : index
    %72 = vector.load %arg11[%c0_32, %c0_33] : memref<8x128xf32, #tpu.memory_space<vmem>>, vector<1x128xf32>
    tpu.vector_store %arg11[%c0_32, %c0_33], %71 {strides = array<i32>} : memref<8x128xf32, #tpu.memory_space<vmem>>, vector<1x128xf32>,
    %73 = vector.broadcast %53 : f32 to vector<1x1xf32>
    %74 = vector.shape_cast %73 : vector<1x1xf32> to vector<1x1xf32>
    %75 = vector.broadcast %74 : vector<1x1xf32> to vector<1x128xf32>
    %c4 = arith.constant 4 : index
    %c0_34 = arith.constant 0 : index
    %76 = vector.load %arg11[%c4, %c0_34] : memref<8x128xf32, #tpu.memory_space<vmem>>, vector<1x128xf32>
    tpu.vector_store %arg11[%c4, %c0_34], %75 {strides = array<i32>} : memref<8x128xf32, #tpu.memory_space<vmem>>, vector<1x128xf32>,
    %cst_35 = arith.constant 2.500000e-02 : f32
    %77 = vector.broadcast %cst_35 : f32 to vector<32x32xf32>
    %78 = arith.mulf %77, %68 : vector<32x32xf32>
    %79 = arith.subf %15, %78 : vector<32x32xf32>
    %cst_36 = arith.constant dense<0.000000e+00> : vector<64x32xf32>
    %80 = tpu.matmul %0, %79, %cst_36 {dimension_numbers = #tpu.dot_dimension_numbers<[1], [0], [0], [1], [0, 0, 1, 1], [], []>} : vector<64x32xf32>, vector<32x32xf32>, vector<64x32xf32> -> vector<64x32xf32>
    %cst_37 = arith.constant dense<0.000000e+00> : vector<64x128xf32>
    %81 = tpu.matmul %80, %2, %cst_37 {dimension_numbers = #tpu.dot_dimension_numbers<[1], [0], [0], [1], [0, 0, 1, 1], [], []>} : vector<64x32xf32>, vector<32x128xf32>, vector<64x128xf32> -> vector<64x128xf32>
    %82 = arith.addf %81, %4 : vector<64x128xf32>
    %83 = vector.extract_strided_slice %82 {offsets = [0, 0], sizes = [32, 128], strides = [1, 1]} : vector<64x128xf32> to vector<32x128xf32>
    %cst_38 = arith.constant dense<0xFF800000> : vector<32xf32>
    %84 = vector.multi_reduction <maximumf>, %83, %cst_38 [1] : vector<32x128xf32> to vector<32xf32>
    %85 = vector.shape_cast %84 : vector<32xf32> to vector<32x1xf32>
    %86 = vector.broadcast %85 : vector<32x1xf32> to vector<32x128xf32>
    %87 = arith.subf %83, %86 : vector<32x128xf32>
    %88 = math.exp %87 : vector<32x128xf32>
    %cst_39 = arith.constant dense<0.000000e+00> : vector<32xf32>
    %89 = vector.multi_reduction <add>, %88, %cst_39 [1] : vector<32x128xf32> to vector<32xf32>
    %90 = vector.shape_cast %89 : vector<32xf32> to vector<32x1xf32>
    %91 = math.log %90 : vector<32x1xf32>
    %92 = arith.addf %91, %85 : vector<32x1xf32>
    %93 = arith.mulf %9, %83 : vector<32x128xf32>
    %cst_40 = arith.constant dense<0.000000e+00> : vector<32xf32>
    %94 = vector.multi_reduction <add>, %93, %cst_40 [1] : vector<32x128xf32> to vector<32xf32>
    %95 = vector.shape_cast %94 : vector<32xf32> to vector<32x1xf32>
    %96 = arith.subf %92, %95 : vector<32x1xf32>
    %97 = arith.mulf %96, %11 : vector<32x1xf32>
    %98 = vector.shape_cast %97 : vector<32x1xf32> to vector<1x32x1xf32>
    %cst_41 = arith.constant dense<0.000000e+00> : vector<1xf32>
    %99 = vector.multi_reduction <add>, %98, %cst_41 [1, 2] : vector<1x32x1xf32> to vector<1xf32>
    %100 = vector.shape_cast %99 : vector<1xf32> to vector<1x1x1xf32>
    %101 = vector.extract %100[0, 0, 0] : f32 from vector<1x1x1xf32>
    %102 = vector.broadcast %85 : vector<32x1xf32> to vector<32x128xf32>
    %103 = arith.cmpf oge, %83, %102 : vector<32x128xf32>
    %cst_42 = arith.constant 1.280000e+02 : f32
    %104 = vector.broadcast %cst_42 : f32 to vector<32x128xf32>
    %105 = arith.select %103, %14, %104 : vector<32x128xi1>, vector<32x128xf32>
    %cst_43 = arith.constant dense<0x7F800000> : vector<32xf32>
    %106 = vector.multi_reduction <minimumf>, %105, %cst_43 [1] : vector<32x128xf32> to vector<32xf32>
    %107 = vector.shape_cast %106 : vector<32xf32> to vector<32x1xf32>
    %108 = arith.cmpf oeq, %107, %8 : vector<32x1xf32>
    %cst_44 = arith.constant 0.000000e+00 : f32
    %109 = vector.broadcast %cst_44 : f32 to vector<32x1xf32>
    %110 = arith.cmpf ogt, %7, %109 : vector<32x1xf32>
    %111 = arith.andi %108, %110 : vector<32x1xi1>
    %112 = arith.extui %111 : vector<32x1xi1> to vector<32x1xi32>
    %113 = arith.sitofp %112 : vector<32x1xi32> to vector<32x1xf32>
    %114 = vector.shape_cast %113 : vector<32x1xf32> to vector<1x32x1xf32>
    %cst_45 = arith.constant dense<0.000000e+00> : vector<1xf32>
    %115 = vector.multi_reduction <add>, %114, %cst_45 [1, 2] : vector<1x32x1xf32> to vector<1xf32>
    %116 = vector.shape_cast %115 : vector<1xf32> to vector<1x1x1xf32>
    %117 = vector.extract %116[0, 0, 0] : f32 from vector<1x1x1xf32>
    %118 = vector.extract_strided_slice %82 {offsets = [32, 0], sizes = [32, 128], strides = [1, 1]} : vector<64x128xf32> to vector<32x128xf32>
    %cst_46 = arith.constant dense<0xFF800000> : vector<32xf32>
    %119 = vector.multi_reduction <maximumf>, %118, %cst_46 [1] : vector<32x128xf32> to vector<32xf32>
    %120 = vector.shape_cast %119 : vector<32xf32> to vector<32x1xf32>
    %121 = vector.broadcast %120 : vector<32x1xf32> to vector<32x128xf32>
    %122 = arith.subf %118, %121 : vector<32x128xf32>
    %123 = math.exp %122 : vector<32x128xf32>
    %cst_47 = arith.constant dense<0.000000e+00> : vector<32xf32>
    %124 = vector.multi_reduction <add>, %123, %cst_47 [1] : vector<32x128xf32> to vector<32xf32>
    %125 = vector.shape_cast %124 : vector<32xf32> to vector<32x1xf32>
    %126 = vector.broadcast %125 : vector<32x1xf32> to vector<32x128xf32>
    %127 = arith.divf %123, %126 : vector<32x128xf32>
    %128 = arith.subf %127, %10 : vector<32x128xf32>
    %129 = vector.broadcast %12 : vector<32x1xf32> to vector<32x128xf32>
    %130 = arith.mulf %128, %129 : vector<32x128xf32>
    %cst_48 = arith.constant dense<0.000000e+00> : vector<32x32xf32>
    %131 = tpu.matmul %130, %3, %cst_48 {dimension_numbers = #tpu.dot_dimension_numbers<[1], [0], [0], [1], [0, 0, 1, 1], [], []>} : vector<32x128xf32>, vector<128x32xf32>, vector<32x32xf32> -> vector<32x32xf32>
    %cst_49 = arith.constant dense<0.000000e+00> : vector<32x32xf32>
    %132 = tpu.matmul %1, %131, %cst_49 {dimension_numbers = #tpu.dot_dimension_numbers<[1], [0], [0], [1], [0, 0, 1, 1], [], []>} : vector<32x32xf32>, vector<32x32xf32>, vector<32x32xf32> -> vector<32x32xf32>
    %133 = vector.broadcast %101 : f32 to vector<1x1xf32>
    %134 = vector.shape_cast %133 : vector<1x1xf32> to vector<1x1xf32>
    %135 = vector.broadcast %134 : vector<1x1xf32> to vector<1x128xf32>
    %c1 = arith.constant 1 : index
    %c0_50 = arith.constant 0 : index
    %136 = vector.load %arg11[%c1, %c0_50] : memref<8x128xf32, #tpu.memory_space<vmem>>, vector<1x128xf32>
    tpu.vector_store %arg11[%c1, %c0_50], %135 {strides = array<i32>} : memref<8x128xf32, #tpu.memory_space<vmem>>, vector<1x128xf32>,
    %137 = vector.broadcast %117 : f32 to vector<1x1xf32>
    %138 = vector.shape_cast %137 : vector<1x1xf32> to vector<1x1xf32>
    %139 = vector.broadcast %138 : vector<1x1xf32> to vector<1x128xf32>
    %c5 = arith.constant 5 : index
    %c0_51 = arith.constant 0 : index
    %140 = vector.load %arg11[%c5, %c0_51] : memref<8x128xf32, #tpu.memory_space<vmem>>, vector<1x128xf32>
    tpu.vector_store %arg11[%c5, %c0_51], %139 {strides = array<i32>} : memref<8x128xf32, #tpu.memory_space<vmem>>, vector<1x128xf32>,
    %cst_52 = arith.constant 2.500000e-02 : f32
    %141 = vector.broadcast %cst_52 : f32 to vector<32x32xf32>
    %142 = arith.mulf %141, %132 : vector<32x32xf32>
    %143 = arith.subf %79, %142 : vector<32x32xf32>
    %cst_53 = arith.constant dense<0.000000e+00> : vector<64x32xf32>
    %144 = tpu.matmul %0, %143, %cst_53 {dimension_numbers = #tpu.dot_dimension_numbers<[1], [0], [0], [1], [0, 0, 1, 1], [], []>} : vector<64x32xf32>, vector<32x32xf32>, vector<64x32xf32> -> vector<64x32xf32>
    %cst_54 = arith.constant dense<0.000000e+00> : vector<64x128xf32>
    %145 = tpu.matmul %144, %2, %cst_54 {dimension_numbers = #tpu.dot_dimension_numbers<[1], [0], [0], [1], [0, 0, 1, 1], [], []>} : vector<64x32xf32>, vector<32x128xf32>, vector<64x128xf32> -> vector<64x128xf32>
    %146 = arith.addf %145, %4 : vector<64x128xf32>
    %147 = vector.extract_strided_slice %146 {offsets = [0, 0], sizes = [32, 128], strides = [1, 1]} : vector<64x128xf32> to vector<32x128xf32>
    %cst_55 = arith.constant dense<0xFF800000> : vector<32xf32>
    %148 = vector.multi_reduction <maximumf>, %147, %cst_55 [1] : vector<32x128xf32> to vector<32xf32>
    %149 = vector.shape_cast %148 : vector<32xf32> to vector<32x1xf32>
    %150 = vector.broadcast %149 : vector<32x1xf32> to vector<32x128xf32>
    %151 = arith.subf %147, %150 : vector<32x128xf32>
    %152 = math.exp %151 : vector<32x128xf32>
    %cst_56 = arith.constant dense<0.000000e+00> : vector<32xf32>
    %153 = vector.multi_reduction <add>, %152, %cst_56 [1] : vector<32x128xf32> to vector<32xf32>
    %154 = vector.shape_cast %153 : vector<32xf32> to vector<32x1xf32>
    %155 = math.log %154 : vector<32x1xf32>
    %156 = arith.addf %155, %149 : vector<32x1xf32>
    %157 = arith.mulf %9, %147 : vector<32x128xf32>
    %cst_57 = arith.constant dense<0.000000e+00> : vector<32xf32>
    %158 = vector.multi_reduction <add>, %157, %cst_57 [1] : vector<32x128xf32> to vector<32xf32>
    %159 = vector.shape_cast %158 : vector<32xf32> to vector<32x1xf32>
    %160 = arith.subf %156, %159 : vector<32x1xf32>
    %161 = arith.mulf %160, %11 : vector<32x1xf32>
    %162 = vector.shape_cast %161 : vector<32x1xf32> to vector<1x32x1xf32>
    %cst_58 = arith.constant dense<0.000000e+00> : vector<1xf32>
    %163 = vector.multi_reduction <add>, %162, %cst_58 [1, 2] : vector<1x32x1xf32> to vector<1xf32>
    %164 = vector.shape_cast %163 : vector<1xf32> to vector<1x1x1xf32>
    %165 = vector.extract %164[0, 0, 0] : f32 from vector<1x1x1xf32>
    %166 = vector.broadcast %149 : vector<32x1xf32> to vector<32x128xf32>
    %167 = arith.cmpf oge, %147, %166 : vector<32x128xf32>
    %cst_59 = arith.constant 1.280000e+02 : f32
    %168 = vector.broadcast %cst_59 : f32 to vector<32x128xf32>
    %169 = arith.select %167, %14, %168 : vector<32x128xi1>, vector<32x128xf32>
    %cst_60 = arith.constant dense<0x7F800000> : vector<32xf32>
    %170 = vector.multi_reduction <minimumf>, %169, %cst_60 [1] : vector<32x128xf32> to vector<32xf32>
    %171 = vector.shape_cast %170 : vector<32xf32> to vector<32x1xf32>
    %172 = arith.cmpf oeq, %171, %8 : vector<32x1xf32>
    %cst_61 = arith.constant 0.000000e+00 : f32
    %173 = vector.broadcast %cst_61 : f32 to vector<32x1xf32>
    %174 = arith.cmpf ogt, %7, %173 : vector<32x1xf32>
    %175 = arith.andi %172, %174 : vector<32x1xi1>
    %176 = arith.extui %175 : vector<32x1xi1> to vector<32x1xi32>
    %177 = arith.sitofp %176 : vector<32x1xi32> to vector<32x1xf32>
    %178 = vector.shape_cast %177 : vector<32x1xf32> to vector<1x32x1xf32>
    %cst_62 = arith.constant dense<0.000000e+00> : vector<1xf32>
    %179 = vector.multi_reduction <add>, %178, %cst_62 [1, 2] : vector<1x32x1xf32> to vector<1xf32>
    %180 = vector.shape_cast %179 : vector<1xf32> to vector<1x1x1xf32>
    %181 = vector.extract %180[0, 0, 0] : f32 from vector<1x1x1xf32>
    %182 = vector.extract_strided_slice %146 {offsets = [32, 0], sizes = [32, 128], strides = [1, 1]} : vector<64x128xf32> to vector<32x128xf32>
    %cst_63 = arith.constant dense<0xFF800000> : vector<32xf32>
    %183 = vector.multi_reduction <maximumf>, %182, %cst_63 [1] : vector<32x128xf32> to vector<32xf32>
    %184 = vector.shape_cast %183 : vector<32xf32> to vector<32x1xf32>
    %185 = vector.broadcast %184 : vector<32x1xf32> to vector<32x128xf32>
    %186 = arith.subf %182, %185 : vector<32x128xf32>
    %187 = math.exp %186 : vector<32x128xf32>
    %cst_64 = arith.constant dense<0.000000e+00> : vector<32xf32>
    %188 = vector.multi_reduction <add>, %187, %cst_64 [1] : vector<32x128xf32> to vector<32xf32>
    %189 = vector.shape_cast %188 : vector<32xf32> to vector<32x1xf32>
    %190 = vector.broadcast %189 : vector<32x1xf32> to vector<32x128xf32>
    %191 = arith.divf %187, %190 : vector<32x128xf32>
    %192 = arith.subf %191, %10 : vector<32x128xf32>
    %193 = vector.broadcast %12 : vector<32x1xf32> to vector<32x128xf32>
    %194 = arith.mulf %192, %193 : vector<32x128xf32>
    %cst_65 = arith.constant dense<0.000000e+00> : vector<32x32xf32>
    %195 = tpu.matmul %194, %3, %cst_65 {dimension_numbers = #tpu.dot_dimension_numbers<[1], [0], [0], [1], [0, 0, 1, 1], [], []>} : vector<32x128xf32>, vector<128x32xf32>, vector<32x32xf32> -> vector<32x32xf32>
    %cst_66 = arith.constant dense<0.000000e+00> : vector<32x32xf32>
    %196 = tpu.matmul %1, %195, %cst_66 {dimension_numbers = #tpu.dot_dimension_numbers<[1], [0], [0], [1], [0, 0, 1, 1], [], []>} : vector<32x32xf32>, vector<32x32xf32>, vector<32x32xf32> -> vector<32x32xf32>
    %197 = vector.broadcast %165 : f32 to vector<1x1xf32>
    %198 = vector.shape_cast %197 : vector<1x1xf32> to vector<1x1xf32>
    %199 = vector.broadcast %198 : vector<1x1xf32> to vector<1x128xf32>
    %c2 = arith.constant 2 : index
    %c0_67 = arith.constant 0 : index
    %200 = vector.load %arg11[%c2, %c0_67] : memref<8x128xf32, #tpu.memory_space<vmem>>, vector<1x128xf32>
    tpu.vector_store %arg11[%c2, %c0_67], %199 {strides = array<i32>} : memref<8x128xf32, #tpu.memory_space<vmem>>, vector<1x128xf32>,
    %201 = vector.broadcast %181 : f32 to vector<1x1xf32>
    %202 = vector.shape_cast %201 : vector<1x1xf32> to vector<1x1xf32>
    %203 = vector.broadcast %202 : vector<1x1xf32> to vector<1x128xf32>
    %c6 = arith.constant 6 : index
    %c0_68 = arith.constant 0 : index
    %204 = vector.load %arg11[%c6, %c0_68] : memref<8x128xf32, #tpu.memory_space<vmem>>, vector<1x128xf32>
    tpu.vector_store %arg11[%c6, %c0_68], %203 {strides = array<i32>} : memref<8x128xf32, #tpu.memory_space<vmem>>, vector<1x128xf32>,
    %cst_69 = arith.constant 2.500000e-02 : f32
    %205 = vector.broadcast %cst_69 : f32 to vector<32x32xf32>
    %206 = arith.mulf %205, %196 : vector<32x32xf32>
    %207 = arith.subf %143, %206 : vector<32x32xf32>
    %cst_70 = arith.constant dense<0.000000e+00> : vector<64x32xf32>
    %208 = tpu.matmul %0, %207, %cst_70 {dimension_numbers = #tpu.dot_dimension_numbers<[1], [0], [0], [1], [0, 0, 1, 1], [], []>} : vector<64x32xf32>, vector<32x32xf32>, vector<64x32xf32> -> vector<64x32xf32>
    %cst_71 = arith.constant dense<0.000000e+00> : vector<64x128xf32>
    %209 = tpu.matmul %208, %2, %cst_71 {dimension_numbers = #tpu.dot_dimension_numbers<[1], [0], [0], [1], [0, 0, 1, 1], [], []>} : vector<64x32xf32>, vector<32x128xf32>, vector<64x128xf32> -> vector<64x128xf32>
    %210 = arith.addf %209, %4 : vector<64x128xf32>
    %211 = vector.extract_strided_slice %210 {offsets = [0, 0], sizes = [32, 128], strides = [1, 1]} : vector<64x128xf32> to vector<32x128xf32>
    %cst_72 = arith.constant dense<0xFF800000> : vector<32xf32>
    %212 = vector.multi_reduction <maximumf>, %211, %cst_72 [1] : vector<32x128xf32> to vector<32xf32>
    %213 = vector.shape_cast %212 : vector<32xf32> to vector<32x1xf32>
    %214 = vector.broadcast %213 : vector<32x1xf32> to vector<32x128xf32>
    %215 = arith.subf %211, %214 : vector<32x128xf32>
    %216 = math.exp %215 : vector<32x128xf32>
    %cst_73 = arith.constant dense<0.000000e+00> : vector<32xf32>
    %217 = vector.multi_reduction <add>, %216, %cst_73 [1] : vector<32x128xf32> to vector<32xf32>
    %218 = vector.shape_cast %217 : vector<32xf32> to vector<32x1xf32>
    %219 = math.log %218 : vector<32x1xf32>
    %220 = arith.addf %219, %213 : vector<32x1xf32>
    %221 = arith.mulf %9, %211 : vector<32x128xf32>
    %cst_74 = arith.constant dense<0.000000e+00> : vector<32xf32>
    %222 = vector.multi_reduction <add>, %221, %cst_74 [1] : vector<32x128xf32> to vector<32xf32>
    %223 = vector.shape_cast %222 : vector<32xf32> to vector<32x1xf32>
    %224 = arith.subf %220, %223 : vector<32x1xf32>
    %225 = arith.mulf %224, %11 : vector<32x1xf32>
    %226 = vector.shape_cast %225 : vector<32x1xf32> to vector<1x32x1xf32>
    %cst_75 = arith.constant dense<0.000000e+00> : vector<1xf32>
    %227 = vector.multi_reduction <add>, %226, %cst_75 [1, 2] : vector<1x32x1xf32> to vector<1xf32>
    %228 = vector.shape_cast %227 : vector<1xf32> to vector<1x1x1xf32>
    %229 = vector.extract %228[0, 0, 0] : f32 from vector<1x1x1xf32>
    %230 = vector.broadcast %213 : vector<32x1xf32> to vector<32x128xf32>
    %231 = arith.cmpf oge, %211, %230 : vector<32x128xf32>
    %cst_76 = arith.constant 1.280000e+02 : f32
    %232 = vector.broadcast %cst_76 : f32 to vector<32x128xf32>
    %233 = arith.select %231, %14, %232 : vector<32x128xi1>, vector<32x128xf32>
    %cst_77 = arith.constant dense<0x7F800000> : vector<32xf32>
    %234 = vector.multi_reduction <minimumf>, %233, %cst_77 [1] : vector<32x128xf32> to vector<32xf32>
    %235 = vector.shape_cast %234 : vector<32xf32> to vector<32x1xf32>
    %236 = arith.cmpf oeq, %235, %8 : vector<32x1xf32>
    %cst_78 = arith.constant 0.000000e+00 : f32
    %237 = vector.broadcast %cst_78 : f32 to vector<32x1xf32>
    %238 = arith.cmpf ogt, %7, %237 : vector<32x1xf32>
    %239 = arith.andi %236, %238 : vector<32x1xi1>
    %240 = arith.extui %239 : vector<32x1xi1> to vector<32x1xi32>
    %241 = arith.sitofp %240 : vector<32x1xi32> to vector<32x1xf32>
    %242 = vector.shape_cast %241 : vector<32x1xf32> to vector<1x32x1xf32>
    %cst_79 = arith.constant dense<0.000000e+00> : vector<1xf32>
    %243 = vector.multi_reduction <add>, %242, %cst_79 [1, 2] : vector<1x32x1xf32> to vector<1xf32>
    %244 = vector.shape_cast %243 : vector<1xf32> to vector<1x1x1xf32>
    %245 = vector.extract %244[0, 0, 0] : f32 from vector<1x1x1xf32>
    %246 = vector.broadcast %229 : f32 to vector<1x1xf32>
    %247 = vector.shape_cast %246 : vector<1x1xf32> to vector<1x1xf32>
    %248 = vector.broadcast %247 : vector<1x1xf32> to vector<1x128xf32>
    %c3 = arith.constant 3 : index
    %c0_80 = arith.constant 0 : index
    %249 = vector.load %arg11[%c3, %c0_80] : memref<8x128xf32, #tpu.memory_space<vmem>>, vector<1x128xf32>
    tpu.vector_store %arg11[%c3, %c0_80], %248 {strides = array<i32>} : memref<8x128xf32, #tpu.memory_space<vmem>>, vector<1x128xf32>,
    %250 = vector.broadcast %245 : f32 to vector<1x1xf32>
    %251 = vector.shape_cast %250 : vector<1x1xf32> to vector<1x1xf32>
    %252 = vector.broadcast %251 : vector<1x1xf32> to vector<1x128xf32>
    %c7 = arith.constant 7 : index
    %c0_81 = arith.constant 0 : index
    %253 = vector.load %arg11[%c7, %c0_81] : memref<8x128xf32, #tpu.memory_space<vmem>>, vector<1x128xf32>
    tpu.vector_store %arg11[%c7, %c0_81], %252 {strides = array<i32>} : memref<8x128xf32, #tpu.memory_space<vmem>>, vector<1x128xf32>,
    return
  }
  func.func @transform_0(%arg0: i32) -> (i32, i32) {
    %c0_i32 = arith.constant 0 : i32
    %c0_i32_0 = arith.constant 0 : i32
    %c0_i32_1 = arith.constant 0 : i32
    return %c0_i32, %c0_i32_0 : i32, i32
  }
  func.func @transform_1(%arg0: i32) -> (i32, i32) {
    %c0_i32 = arith.constant 0 : i32
    %c0_i32_0 = arith.constant 0 : i32
    %c0_i32_1 = arith.constant 0 : i32
    return %c0_i32, %c0_i32_0 : i32, i32
  }
  func.func @transform_2(%arg0: i32) -> (i32, i32) {
    %c0_i32 = arith.constant 0 : i32
    %c0_i32_0 = arith.constant 0 : i32
    %c0_i32_1 = arith.constant 0 : i32
    return %c0_i32, %c0_i32_0 : i32, i32
  }
  func.func @transform_3(%arg0: i32) -> (i32, i32) {
    %c0_i32 = arith.constant 0 : i32
    %c0_i32_0 = arith.constant 0 : i32
    %c0_i32_1 = arith.constant 0 : i32
    return %c0_i32, %c0_i32_0 : i32, i32
  }
  func.func @transform_4(%arg0: i32) -> (i32, i32) {
    %c0_i32 = arith.constant 0 : i32
    %c0_i32_0 = arith.constant 0 : i32
    %c0_i32_1 = arith.constant 0 : i32
    return %c0_i32, %c0_i32_0 : i32, i32
  }
  func.func @transform_5(%arg0: i32) -> (i32, i32) {
    %c0_i32 = arith.constant 0 : i32
    %c0_i32_0 = arith.constant 0 : i32
    %c0_i32_1 = arith.constant 0 : i32
    return %c0_i32, %c0_i32_0 : i32, i32
  }
  func.func @transform_6(%arg0: i32) -> (i32, i32) {
    %c0_i32 = arith.constant 0 : i32
    %c0_i32_0 = arith.constant 0 : i32
    %c0_i32_1 = arith.constant 0 : i32
    return %c0_i32, %c0_i32_0 : i32, i32
  }
  func.func @transform_7(%arg0: i32) -> (i32, i32) {
    %c0_i32 = arith.constant 0 : i32
    %c0_i32_0 = arith.constant 0 : i32
    %c0_i32_1 = arith.constant 0 : i32
    return %c0_i32, %c0_i32_0 : i32, i32
  }
  func.func @transform_8(%arg0: i32) -> (i32, i32) {
    %c0_i32 = arith.constant 0 : i32
    %c0_i32_0 = arith.constant 0 : i32
    %c0_i32_1 = arith.constant 0 : i32
    return %c0_i32, %c0_i32_0 : i32, i32
  }
  func.func @transform_9(%arg0: i32) -> (i32, i32) {
    %c0_i32 = arith.constant 0 : i32
    %c0_i32_0 = arith.constant 0 : i32
    %c0_i32_1 = arith.constant 0 : i32
    return %c0_i32, %c0_i32_0 : i32, i32
  }
  func.func @transform_10(%arg0: i32) -> (i32, i32) {
    %c0_i32 = arith.constant 0 : i32
    %c0_i32_0 = arith.constant 0 : i32
    %c0_i32_1 = arith.constant 0 : i32
    return %c0_i32, %c0_i32_0 : i32, i32
  }
}

</mosaic_0001>

<bundles_post_ra>
// kernel: div.13
= control target key start
LH: loop header
LB: loop body
LE: loop exit
PB: predicated region body
PF: predicated region fallthrough
CT: control target
= control target key end

     0   :  { %s37_s0 = inlined_call_operand.vmem [shape: f32[32,1], index: 0, kind: input, shape index: {}]   ;;  %s38_s1 = inlined_call_operand.vmem [shape: f32[32,1], index: 1, kind: input, shape index: {}]   ;;  %s39_s2 = inlined_call_operand.vmem [shape: f32[32,1], index: 2, kind: output, shape index: {}]  }
   0x1   :  { %v4_v0 = vld [vmem:[%s38_s1] sm:$0x1] }
   0x2   :  { %11 = vrcp.f32 %v4_v0  ;;  %v3_v1 = vld [vmem:[%s37_s0] sm:$0x1] }
   0xf   :  { %v12_v2 = vpop.eup %11 }
  0x10   :  { %v8_v3 = vmul.f32 %v12_v2, %v3_v1 }
  0x12   :  { %10 = vst [vmem:[%s39_s2] sm:$0x1] %v8_v3 }

// kernel: meta_trainer_forward.1
= control target key start
LH: loop header
LB: loop body
LE: loop exit
PB: predicated region body
PF: predicated region fallthrough
CT: control target
= control target key end

     0   :  { %vm106_vm0 = vcmask 261120   ;;  %v3014_v40 = vmov 0   ;;  %s4338_s0 = inlined_call_operand.vmem [shape: f32[32,32], index: 0, kind: input, shape index: {}]   ;;  %s4339_s1 = inlined_call_operand.vmem [shape: f32[64,32], index: 1, kind: input, shape index: {}]   ;;  %s4340_s3 = inlined_call_operand.vmem [shape: f32[32,128], index: 3, kind: input, shape index: {}]   ;;  %s4341_s5 = inlined_call_operand.vmem [shape: f32[64,128], index: 5, kind: input, shape index: {}]   ;;  %s4342_s4 = inlined_call_operand.vmem [shape: f32[128,32], index: 4, kind: input, shape index: {}]   ;;  %s4343_s7 = inlined_call_operand.vmem [shape: f32[64,1], index: 7, kind: input, shape index: {}]   ;;  %s4344_s6 = inlined_call_operand.vmem [shape: f32[64,128], index: 6, kind: input, shape index: {}]   ;;  %s4345_s2 = inlined_call_operand.vmem [shape: f32[32,32], index: 2, kind: input, shape index: {}]   ;;  %s4346_s8 = inlined_call_operand.vmem [shape: f32[32,1], index: 8, kind: input, shape index: {}]   ;;  %s4347_s9 = inlined_call_operand.vmem [shape: f32[32,1], index: 9, kind: input, shape index: {}]   ;;  %s4348_s10 = inlined_call_operand.vmem [shape: f32[8,128], index: 10, kind: output, shape index: {}]  }
   0x1   :  { %v3074_v0 = vld [vmem:[%s4338_s0 + $0x18] sm:$0xff]  ;;  %v3079_v1 = vld [vmem:[%s4338_s0 + $0x10] sm:$0xff]  ;;  %v3085_v2 = vld [vmem:[%s4339_s1] sm:$0xff]  ;;  %2889 = vset.pattern.permute.xlu1 %v3014_v40  ;;  %2888 = vset.pattern.permute.xlu0 %v3014_v40 }
   0x2   :  { %2554 = vmatprep.subr.mxu0 %v3074_v0  ;;  %v3091_v3 = vld [vmem:[%s4338_s0 + $0x8] sm:$0xff]  ;;  %2562 = vmatprep.mubr.msk.f32.mxu0 %vm106_vm0, %v3085_v2  ;;  %v3100_v4 = vld [vmem:[%s4338_s0] sm:$0xff]  ;;  %v3105_v5 = vld [vmem:[%s4340_s3 + $0x18] sm:$0xff] }
   0x3   :  { %2555 = vmatpush3.msra.mxu0 %v3074_v0  ;;  %v3110_v6 = vld [vmem:[%s4340_s3 + $0x10] sm:$0xff]  ;;  %2574 = vmatprep.subr.mxu1 %v3105_v5  ;;  %v3118_v7 = vld [vmem:[%s4339_s1 + $0x8] sm:$0xff]  ;;  %v3137_v9 = vld [vmem:[%s4339_s1 + $0x18] sm:$0xff] }
   0x4   :  { %2556 = vmatprep.subr.mxu0 %v3079_v1  ;;  %2575 = vmatpush3.msra.mxu1 %v3105_v5  ;;  %v3125_v8 = vld [vmem:[%s4339_s1 + $0x10] sm:$0xff]  ;;  %v3142_v10 = vld [vmem:[%s4339_s1 + $0x20] sm:$0xff]  ;;  %v3151_v11 = vld [vmem:[%s4339_s1 + $0x28] sm:$0xff] }
   0x5   :  { %2557 = vmatpush3.msra.mxu0 %v3079_v1  ;;  %2576 = vmatprep.subr.mxu1 %v3110_v6  ;;  %v3156_v12 = vld [vmem:[%s4339_s1 + $0x30] sm:$0xff]  ;;  %v3165_v13 = vld [vmem:[%s4339_s1 + $0x38] sm:$0xff]  ;;  %v3172_v14 = vld [vmem:[%s4340_s3 + $0x8] sm:$0xff] }
   0x6   :  { %2558 = vmatprep.subr.mxu0 %v3091_v3  ;;  %2577 = vmatpush3.msra.mxu1 %v3110_v6  ;;  %v3179_v15 = vld [vmem:[%s4340_s3] sm:$0xff]  ;;  %v3208_v32 = vld [vmem:[%s4341_s5 + $0x28] sm:$0xff]  ;;  %v3213_v34 = vld [vmem:[%s4341_s5 + $0x30] sm:$0xff] }
   0x7   :  { %2559 = vmatpush3.msra.mxu0 %v3091_v3  ;;  %2578 = vmatprep.subr.mxu1 %v3172_v14  ;;  %v3202_v29 = vld [vmem:[%s4341_s5 + $0x20] sm:$0xff]  ;;  %4356 = vst [vmem:[#allocation7_spill] sm:$0xff] %v3213_v34  ;;  %v3220_v38 = vld [vmem:[%s4341_s5 + $0x38] sm:$0xff]  ;;  %v3231_v42 = vld [vmem:[%s4342_s4 + $0x70] sm:$0xff] }
   0x8   :  { %2560 = vmatprep.subr.mxu0 %v3100_v4  ;;  %2579 = vmatpush3.msra.mxu1 %v3172_v14  ;;  %4355 = vst [vmem:[#allocation6_spill] sm:$0xff] %v3202_v29  ;;  %v3226_v41 = vld [vmem:[%s4342_s4 + $0x78] sm:$0xff]  ;;  %v3238_v43 = vld [vmem:[%s4342_s4 + $0x68] sm:$0xff]  ;;  %v3245_v44 = vld [vmem:[%s4342_s4 + $0x60] sm:$0xff] }
   0x9   :  { %2561 = vmatpush3.msra.mxu0 %v3100_v4  ;;  %2580 = vmatprep.subr.mxu1 %v3179_v15  ;;  %v3266_v61 = vld [vmem:[%s4342_s4 + $0x58] sm:$0xff]  ;;  %v3271_v62 = vld [vmem:[%s4342_s4 + $0x50] sm:$0xff]  ;;  %v3280_v63 = vld [vmem:[%s4342_s4 + $0x48] sm:$0xff] }
   0xa   :  { %2563 = vmatmul.mubr.msk.f32.vlgmr.msra.gmra.mxu0 %vm106_vm0, %v3118_v7  ;;  %2581 = vmatpush3.msra.mxu1 %v3179_v15 }
   0xb   :  { %2565 = vmatprep.mubr.msk.f32.mxu0 %vm106_vm0, %v3125_v8  ;;  %2594 = vmatprep.subr.mxu0 %v3226_v41 }
   0xc   :  { %2595 = vmatpush3.msra.mxu0 %v3226_v41 }
   0xd   :  { %2596 = vmatprep.subr.mxu0 %v3231_v42 }
   0xe   :  { %2566 = vmatmul.mubr.msk.f32.gmra.mxu0 %vm106_vm0, %v3137_v9 }
   0xf   :  { %2568 = vmatprep.mubr.msk.f32.mxu0 %vm106_vm0, %v3142_v10  ;;  %2597 = vmatpush3.msra.mxu0 %v3231_v42 }
  0x10   :  { %2598 = vmatprep.subr.mxu0 %v3238_v43 }
  0x11   :  { %2599 = vmatpush3.msra.mxu0 %v3238_v43 }
  0x12   :  { %2569 = vmatmul.mubr.msk.f32.gmra.mxu0 %vm106_vm0, %v3151_v11  ;;  %2600 = vmatprep.subr.mxu0 %v3245_v44 }
  0x13   :  { %2571 = vmatprep.mubr.msk.f32.mxu0 %vm106_vm0, %v3156_v12  ;;  %2601 = vmatpush3.msra.mxu0 %v3245_v44 }
  0x14   :  { %2602 = vmatprep.subr.mxu0 %v3266_v61 }
  0x15   :  { %2603 = vmatpush3.msra.mxu0 %v3266_v61 }
  0x16   :  { %2572 = vmatmul.mubr.msk.f32.gmra.mxu0 %vm106_vm0, %v3165_v13  ;;  %2604 = vmatprep.subr.mxu0 %v3271_v62 }
  0x17   :  { %2605 = vmatpush3.msra.mxu0 %v3271_v62 }
  0x18   :  { %2606 = vmatprep.subr.mxu0 %v3280_v63 }
  0x19   :  { %2607 = vmatpush3.msra.mxu0 %v3280_v63 }
  0xca   :  { %v2564_v16 = vpop.f32.mrf.mxu0 }
  0xcc   :  { %v197_v17 = vpop.f32.mrf.mxu0 }
  0xcd   :  { %2582 = vmatprep.mubr.msk.f32.mxu1 %vm106_vm0, %v197_v17  ;;  %v3294_v17 = vld [vmem:[%s4342_s4 + $0x38] sm:$0xff] }
  0xce   :  { %v2567_v18 = vpop.f32.mrf.mxu0  ;;  %2583 = vmatmul.mubr.msk.f32.vlgmr.msra.gmra.mxu1 %vm106_vm0, %v2564_v16  ;;  %v3286_v16 = vld [vmem:[%s4342_s4 + $0x40] sm:$0xff] }
  0xcf   :  { %2608 = vmatprep.subr.mxu0 %v3286_v16 }
  0xd0   :  { %v207_v19 = vpop.f32.mrf.mxu0  ;;  %2609 = vmatpush3.msra.mxu0 %v3286_v16 }
  0xd1   :  { %2585 = vmatprep.mubr.msk.f32.mxu1 %vm106_vm0, %v207_v19  ;;  %2610 = vmatprep.subr.mxu0 %v3294_v17  ;;  %v88_v19 = vld [vmem:[%s4343_s7 + $0x28] sm:$0xff] }
  0xd2   :  { %v2570_v20 = vpop.f32.mrf.mxu0  ;;  %2586 = vmatmul.mubr.msk.f32.gmra.mxu1 %vm106_vm0, %v2567_v18  ;;  %v3299_v18 = vld [vmem:[%s4342_s4 + $0x30] sm:$0xff]  ;;  %2611 = vmatpush3.msra.mxu0 %v3294_v17 }
  0xd3   :  { %2612 = vmatprep.subr.mxu0 %v3299_v18 }
  0xd4   :  { %v217_v21 = vpop.f32.mrf.mxu0  ;;  %2613 = vmatpush3.msra.mxu0 %v3299_v18 }
  0xd5   :  { %2588 = vmatprep.mubr.msk.f32.mxu1 %vm106_vm0, %v217_v21  ;;  %v87_v21 = vld [vmem:[%s4343_s7 + $0x20] sm:$0xff] }
  0xd6   :  { %v2573_v22 = vpop.f32.mrf.mxu0  ;;  %2589 = vmatmul.mubr.msk.f32.gmra.mxu1 %vm106_vm0, %v2570_v20  ;;  %v3311_v20 = vld [vmem:[%s4342_s4 + $0x28] sm:$0xff] }
  0xd7   :  { %2614 = vmatprep.subr.mxu0 %v3311_v20 }
  0xd8   :  { %v227_v23 = vpop.f32.mrf.mxu0  ;;  %2615 = vmatpush3.msra.mxu0 %v3311_v20 }
  0xd9   :  { %2591 = vmatprep.mubr.msk.f32.mxu1 %vm106_vm0, %v227_v23  ;;  %v89_v23 = vld [vmem:[%s4343_s7 + $0x30] sm:$0xff] }
  0xda   :  { %2592 = vmatmul.mubr.msk.f32.gmra.mxu1 %vm106_vm0, %v2573_v22  ;;  %v3321_v22 = vld [vmem:[%s4342_s4 + $0x20] sm:$0xff] }
  0xdb   :  { %2616 = vmatprep.subr.mxu0 %v3321_v22 }
  0xdc   :  { %2617 = vmatpush3.msra.mxu0 %v3321_v22 }
 0x18e   :  { %v3191_v24 = vpop.f32.mrf.mxu1 }
 0x18f   :  { %4351 = vst [vmem:[#allocation2_spill] sm:$0xff] %v3191_v24 }
 0x190   :  { %v3193_v25 = vpop.f32.mrf.mxu1 }
 0x191   :  { %4352 = vst [vmem:[#allocation3_spill] sm:$0xff] %v3193_v25 }
 0x192   :  { %v3195_v26 = vpop.f32.mrf.mxu1 }
 0x193   :  { %4353 = vst [vmem:[#allocation4_spill] sm:$0xff] %v3195_v26 }
 0x194   :  { %v3197_v27 = vpop.f32.mrf.mxu1 }
 0x195   :  { %4354 = vst [vmem:[#allocation5_spill] sm:$0xff] %v3197_v27 }
 0x196   :  { %v2590_v28 = vpop.f32.mrf.mxu1 }
 0x197   :  { %v352_v36 = vadd.f32 %v2590_v28, %v3208_v32  ;;  %v3331_v28 = vld [vmem:[%s4342_s4 + $0x18] sm:$0xff] }
 0x198   :  { %v346_v30 = vpop.f32.mrf.mxu1  ;;  %2618 = vmatprep.subr.mxu0 %v3331_v28 }
 0x199   :  { %v347_v31 = vadd.f32 %v346_v30, %v3202_v29  ;;  %2619 = vmatpush3.msra.mxu0 %v3331_v28  ;;  %v3338_v30 = vld [vmem:[%s4342_s4 + $0x10] sm:$0xff] }
 0x19a   :  { %v2593_v33 = vpop.f32.mrf.mxu1  ;;  %2620 = vmatprep.subr.mxu0 %v3338_v30 }
 0x19b   :  { %494 = vmax.xlane.f32.xlu0 %v347_v31  ;;  %v362_v39 = vadd.f32 %v2593_v33, %v3220_v38  ;;  %2621 = vmatpush3.msra.mxu0 %v3338_v30  ;;  %v3348_v33 = vld [vmem:[%s4342_s4 + $0x8] sm:$0xff] }
 0x19c   :  { %v356_v35 = vpop.f32.mrf.mxu1  ;;  %2622 = vmatprep.subr.mxu0 %v3348_v33 }
 0x19d   :  { %v357_v37 = vadd.f32 %v356_v35, %v3213_v34  ;;  %2623 = vmatpush3.msra.mxu0 %v3348_v33  ;;  %v3355_v35 = vld [vmem:[%s4342_s4] sm:$0xff] }
 0x19e   :  { %2624 = vmatprep.subr.mxu0 %v3355_v35 }
 0x19f   :  { %496 = vmax.xlane.f32.xlu0 %v352_v36  ;;  %498 = vmax.xlane.f32.xlu1 %v357_v37 }
 0x1a0   :  { %2625 = vmatpush3.msra.mxu0 %v3355_v35 }
 0x1a1   :  { %2666 = vmatprep.subr.mxu0 %v3105_v5 }
 0x1a3   :  { %500 = vmax.xlane.f32.xlu1 %v362_v39 }
 0x224   :  { %v495_v45 = vpop.xlane.xlu0 %494 }
 0x225   :  { %v502_v46 = vsub.f32 %v347_v31, %v495_v45  ;;  %v90_v31 = vld [vmem:[%s4343_s7 + $0x38] sm:$0xff] }
 0x227   :  { %v506_v47 = vmul.f32 1.442695, %v502_v46 }
 0x228   :  { %v497_v48 = vpop.xlane.xlu0 %496  ;;  %v499_v49 = vpop.xlane.xlu1 %498 }
 0x229   :  { %2890 = vpow2.f32 %v506_v47  ;;  %v503_v50 = vsub.f32 %v352_v36, %v497_v48  ;;  %v504_v51 = vsub.f32 %v357_v37, %v499_v49  ;;  %v3365_v47 = vld [vmem:[%s4344_s6 + $0x20] sm:$0xff] }
 0x22b   :  { %v508_v52 = vmul.f32 1.442695, %v503_v50  ;;  %v510_v53 = vmul.f32 1.442695, %v504_v51 }
 0x22c   :  { %v501_v54 = vpop.xlane.xlu1 %500 }
 0x22d   :  { %2892 = vpow2.f32 %v508_v52  ;;  %v505_v55 = vsub.f32 %v362_v39, %v501_v54  ;;  %v3374_v52 = vld [vmem:[%s4344_s6 + $0x28] sm:$0xff] }
 0x22e   :  { %2894 = vpow2.f32 %v510_v53 }
 0x22f   :  { %v512_v56 = vmul.f32 1.442695, %v505_v55  ;;  %v3380_v55 = vld [vmem:[%s4344_s6 + $0x30] sm:$0xff] }
 0x231   :  { %2896 = vpow2.f32 %v512_v56 }
 0x236   :  { %v3251_v57 = vpop.eup %2890 }
 0x237   :  { %514 = vadd.xlane.f32.xlu0 %v3251_v57 }
 0x23a   :  { %v3254_v58 = vpop.eup %2892 }
 0x23b   :  { %v3256_v59 = vpop.eup %2894  ;;  %516 = vadd.xlane.f32.xlu1 %v3254_v58 }
 0x23c   :  { %518 = vadd.xlane.f32.xlu0 %v3256_v59 }
 0x23e   :  { %v3260_v60 = vpop.eup %2896 }
 0x23f   :  { %520 = vadd.xlane.f32.xlu1 %v3260_v60 }
 0x250   :  { %541 = vperm.xlu1 %2889, %v88_v19  }
 0x252   :  { %536 = vperm.xlu0 %2888, %v87_v21  }
 0x254   :  { %546 = vperm.xlu1 %2889, %v89_v23  }
 0x258   :  { %551 = vperm.xlu1 %2889, %v90_v31  }
 0x2c0   :  { %v515_v36 = vpop.xlane.xlu0 %514 }
 0x2c1   :  { %2898 = vrcp.f32 %v515_v36 }
 0x2c4   :  { %v517_v37 = vpop.xlane.xlu1 %516 }
 0x2c5   :  { %v519_v39 = vpop.xlane.xlu0 %518  ;;  %2900 = vrcp.f32 %v517_v37 }
 0x2c6   :  { %2902 = vrcp.f32 %v519_v39 }
 0x2c8   :  { %v521_v40 = vpop.xlane.xlu1 %520 }
 0x2c9   :  { %2904 = vrcp.f32 %v521_v40 }
 0x2cc   :  { %v3360_v46 = vpop.permute.xlu1 %541 }
 0x2cd   :  { %v3368_v49 = vpop.permute.xlu0 %536 }
 0x2ce   :  { %v2899_v45 = vpop.eup %2898 }
 0x2cf   :  { %v523_v48 = vmul.f32 %v2899_v45, %v3251_v57 }
 0x2d0   :  { %v3384_v19 = vpop.permute.xlu1 %546 }
 0x2d1   :  { %v530_v50 = vsub.f32 %v523_v48, %v3365_v47 }
 0x2d2   :  { %v2901_v51 = vpop.eup %2900 }
 0x2d3   :  { %v2903_v53 = vpop.eup %2902  ;;  %v525_v54 = vmul.f32 %v2901_v51, %v3254_v58  ;;  %v554_v56 = vmul.f32 %v3368_v49, %v530_v50  ;;  %v3391_v58 = vld [vmem:[%s4344_s6 + $0x38] sm:$0xff] }
 0x2d4   :  { %v527_v57 = vmul.f32 %v2903_v53, %v3256_v59  ;;  %v3397_v40 = vpop.permute.xlu1 %551 }
 0x2d5   :  { %v531_v21 = vsub.f32 %v525_v54, %v3374_v52  ;;  %2626 = vmatprep.mubr.f32.mxu0 %v554_v56  ;;  %v3417_v54 = vld [vmem:[%s4345_s2 + $0x8] sm:$0xff]  ;;  %v3422_v56 = vld [vmem:[%s4345_s2 + $0x10] sm:$0xff] }
 0x2d6   :  { %v2905_v23 = vpop.eup %2904  ;;  %v532_v31 = vsub.f32 %v527_v57, %v3380_v55  ;;  %v3431_v57 = vld [vmem:[%s4345_s2 + $0x18] sm:$0xff] }
 0x2d7   :  { %v555_v36 = vmul.f32 %v3360_v46, %v531_v21  ;;  %v529_v37 = vmul.f32 %v2905_v23, %v3260_v60  ;;  %v3410_v60 = vld [vmem:[%s4345_s2] sm:$0xff] }
 0x2d8   :  { %v556_v39 = vmul.f32 %v3384_v19, %v532_v31  ;;  %2640 = vmatprep.mubr.msk.f32.mxu1 %vm106_vm0, %v3410_v60 }
 0x2d9   :  { %v533_v59 = vsub.f32 %v529_v37, %v3391_v58  ;;  %2627 = vmatmul.mubr.f32.vlgmr.msra.gmra.mxu0 %v555_v36 }
 0x2da   :  { %2629 = vmatprep.mubr.f32.mxu0 %v556_v39  ;;  %2667 = vmatpush3.msra.mxu0 %v3105_v5 }
 0x2db   :  { %v557_v45 = vmul.f32 %v3397_v40, %v533_v59  ;;  %2668 = vmatprep.subr.mxu0 %v3110_v6 }
 0x2dc   :  { %2669 = vmatpush3.msra.mxu0 %v3110_v6 }
 0x2dd   :  { %2630 = vmatmul.mubr.f32.gmra.mxu0 %v557_v45  ;;  %2670 = vmatprep.subr.mxu0 %v3172_v14 }
 0x2de   :  { %2671 = vmatpush3.msra.mxu0 %v3172_v14 }
 0x2df   :  { %2672 = vmatprep.subr.mxu0 %v3179_v15 }
 0x2e0   :  { %2673 = vmatpush3.msra.mxu0 %v3179_v15 }
 0x399   :  { %v2628_v48 = vpop.f32.mrf.mxu0 }
 0x39b   :  { %v624_v50 = vpop.f32.mrf.mxu0 }
 0x39d   :  { %v2631_v51 = vpop.f32.mrf.mxu0 }
 0x39e   :  { %2632 = vmatprep.subr.mxu1 %v2631_v51 }
 0x39f   :  { %v634_v53 = vpop.f32.mrf.mxu0  ;;  %2633 = vmatpush3.msra.mxu1 %v2631_v51 }
 0x3a0   :  { %2634 = vmatprep.subr.mxu1 %v634_v53 }
 0x3a1   :  { %2635 = vmatpush3.msra.mxu1 %v634_v53 }
 0x3a2   :  { %2636 = vmatprep.subr.mxu1 %v2628_v48 }
 0x3a3   :  { %2637 = vmatpush3.msra.mxu1 %v2628_v48 }
 0x3a4   :  { %2638 = vmatprep.subr.mxu1 %v624_v50 }
 0x3a5   :  { %2639 = vmatpush3.msra.mxu1 %v624_v50 }
 0x3a6   :  { %2641 = vmatmul.mubr.msk.f32.vlgmr.msra.gmra.mxu1 %vm106_vm0, %v3417_v54 }
 0x3a7   :  { %2643 = vmatprep.mubr.msk.f32.mxu1 %vm106_vm0, %v3422_v56 }
 0x3aa   :  { %2644 = vmatmul.mubr.msk.f32.gmra.mxu1 %vm106_vm0, %v3431_v57 }
 0x3ab   :  { %2654 = vmatprep.mubr.msk.f32.mxu1 %vm106_vm0, %v3085_v2 }
 0x466   :  { %v2642_v21 = vpop.f32.mrf.mxu1 }
 0x467   :  { %v745_v39 = vmul.f32 0.025, %v2642_v21 }
 0x468   :  { %v721_v23 = vpop.f32.mrf.mxu1 }
 0x469   :  { %v744_v48 = vmul.f32 0.025, %v721_v23  ;;  %v3446_v51 = vsub.f32 %v3091_v3, %v745_v39 }
 0x46a   :  { %v2645_v31 = vpop.f32.mrf.mxu1 }
 0x46b   :  { %v747_v36 = vmul.f32 0.025, %v2645_v31  ;;  %v3451_v53 = vsub.f32 %v3100_v4, %v744_v48 }
 0x46c   :  { %v731_v37 = vpop.f32.mrf.mxu1 }
 0x46d   :  { %v3438_v59 = vsub.f32 %v3074_v0, %v747_v36  ;;  %v746_v45 = vmul.f32 0.025, %v731_v37 }
 0x46f   :  { %v3441_v50 = vsub.f32 %v3079_v1, %v746_v45  ;;  %2646 = vmatprep.subr.mxu1 %v3438_v59 }
 0x470   :  { %2647 = vmatpush3.msra.mxu1 %v3438_v59 }
 0x471   :  { %2648 = vmatprep.subr.mxu1 %v3441_v50 }
 0x472   :  { %2649 = vmatpush3.msra.mxu1 %v3441_v50 }
 0x473   :  { %2650 = vmatprep.subr.mxu1 %v3446_v51 }
 0x474   :  { %2651 = vmatpush3.msra.mxu1 %v3446_v51 }
 0x475   :  { %2652 = vmatprep.subr.mxu1 %v3451_v53 }
 0x476   :  { %2653 = vmatpush3.msra.mxu1 %v3451_v53 }
 0x477   :  { %2655 = vmatmul.mubr.msk.f32.vlgmr.msra.gmra.mxu1 %vm106_vm0, %v3118_v7  ;;  %2686 = vmatprep.subr.mxu1 %v3226_v41 }
 0x478   :  { %2657 = vmatprep.mubr.msk.f32.mxu1 %vm106_vm0, %v3125_v8  ;;  %2687 = vmatpush3.msra.mxu1 %v3226_v41 }
 0x479   :  { %2688 = vmatprep.subr.mxu1 %v3231_v42 }
 0x47a   :  { %2689 = vmatpush3.msra.mxu1 %v3231_v42 }
 0x47b   :  { %2658 = vmatmul.mubr.msk.f32.gmra.mxu1 %vm106_vm0, %v3137_v9  ;;  %2690 = vmatprep.subr.mxu1 %v3238_v43 }
 0x47c   :  { %2660 = vmatprep.mubr.msk.f32.mxu1 %vm106_vm0, %v3142_v10  ;;  %2691 = vmatpush3.msra.mxu1 %v3238_v43 }
 0x47d   :  { %2692 = vmatprep.subr.mxu1 %v3245_v44 }
 0x47e   :  { %2693 = vmatpush3.msra.mxu1 %v3245_v44 }
 0x47f   :  { %2661 = vmatmul.mubr.msk.f32.gmra.mxu1 %vm106_vm0, %v3151_v11  ;;  %2694 = vmatprep.subr.mxu1 %v3266_v61 }
 0x480   :  { %2663 = vmatprep.mubr.msk.f32.mxu1 %vm106_vm0, %v3156_v12  ;;  %2695 = vmatpush3.msra.mxu1 %v3266_v61 }
 0x481   :  { %2696 = vmatprep.subr.mxu1 %v3271_v62 }
 0x482   :  { %2697 = vmatpush3.msra.mxu1 %v3271_v62 }
 0x483   :  { %2664 = vmatmul.mubr.msk.f32.gmra.mxu1 %vm106_vm0, %v3165_v13  ;;  %2698 = vmatprep.subr.mxu1 %v3280_v63 }
 0x484   :  { %2699 = vmatpush3.msra.mxu1 %v3280_v63 }
 0x485   :  { %2700 = vmatprep.subr.mxu1 %v3286_v16 }
 0x486   :  { %2701 = vmatpush3.msra.mxu1 %v3286_v16 }
 0x487   :  { %2702 = vmatprep.subr.mxu1 %v3294_v17 }
 0x488   :  { %2703 = vmatpush3.msra.mxu1 %v3294_v17 }
 0x489   :  { %2704 = vmatprep.subr.mxu1 %v3299_v18 }
 0x48a   :  { %2705 = vmatpush3.msra.mxu1 %v3299_v18 }
 0x48b   :  { %2706 = vmatprep.subr.mxu1 %v3311_v20 }
 0x48c   :  { %2707 = vmatpush3.msra.mxu1 %v3311_v20 }
 0x48d   :  { %2708 = vmatprep.subr.mxu1 %v3321_v22 }
 0x48e   :  { %2709 = vmatpush3.msra.mxu1 %v3321_v22 }
 0x48f   :  { %2710 = vmatprep.subr.mxu1 %v3331_v28 }
 0x490   :  { %2711 = vmatpush3.msra.mxu1 %v3331_v28 }
 0x491   :  { %2712 = vmatprep.subr.mxu1 %v3338_v30 }
 0x492   :  { %2713 = vmatpush3.msra.mxu1 %v3338_v30 }
 0x493   :  { %2714 = vmatprep.subr.mxu1 %v3348_v33 }
 0x494   :  { %2715 = vmatpush3.msra.mxu1 %v3348_v33 }
 0x495   :  { %2716 = vmatprep.subr.mxu1 %v3355_v35 }
 0x496   :  { %2717 = vmatpush3.msra.mxu1 %v3355_v35 }
 0x537   :  { %v2656_v0 = vpop.f32.mrf.mxu1 }
 0x539   :  { %v818_v1 = vpop.f32.mrf.mxu1 }
 0x53a   :  { %2674 = vmatprep.mubr.msk.f32.mxu0 %vm106_vm0, %v818_v1 }
 0x53b   :  { %v2659_v3 = vpop.f32.mrf.mxu1  ;;  %2675 = vmatmul.mubr.msk.f32.vlgmr.msra.gmra.mxu0 %vm106_vm0, %v2656_v0 }
 0x53d   :  { %v828_v4 = vpop.f32.mrf.mxu1 }
 0x53e   :  { %2677 = vmatprep.mubr.msk.f32.mxu0 %vm106_vm0, %v828_v4 }
 0x53f   :  { %v2662_v21 = vpop.f32.mrf.mxu1  ;;  %2678 = vmatmul.mubr.msk.f32.gmra.mxu0 %vm106_vm0, %v2659_v3 }
 0x541   :  { %v838_v23 = vpop.f32.mrf.mxu1 }
 0x542   :  { %2680 = vmatprep.mubr.msk.f32.mxu0 %vm106_vm0, %v838_v23 }
 0x543   :  { %v2665_v31 = vpop.f32.mrf.mxu1  ;;  %2681 = vmatmul.mubr.msk.f32.gmra.mxu0 %vm106_vm0, %v2662_v21 }
 0x545   :  { %v848_v36 = vpop.f32.mrf.mxu1 }
 0x546   :  { %2683 = vmatprep.mubr.msk.f32.mxu0 %vm106_vm0, %v848_v36 }
 0x547   :  { %2684 = vmatmul.mubr.msk.f32.gmra.mxu0 %vm106_vm0, %v2665_v31 }
 0x548   :  { %2746 = vmatprep.mubr.msk.f32.mxu0 %vm106_vm0, %v3085_v2 }
 0x5fb   :  { %v3513_v37 = vpop.f32.mrf.mxu0 }
 0x5fc   :  { %4357 = vst [vmem:[#allocation8_spill] sm:$0xff] %v3513_v37 }
 0x5fd   :  { %v3515_v39 = vpop.f32.mrf.mxu0 }
 0x5fe   :  { %4358 = vst [vmem:[#allocation9_spill] sm:$0xff] %v3515_v39 }
 0x5ff   :  { %v3517_v45 = vpop.f32.mrf.mxu0 }
 0x600   :  { %4359 = vst [vmem:[#allocation10_spill] sm:$0xff] %v3517_v45 }
 0x601   :  { %v3519_v48 = vpop.f32.mrf.mxu0 }
 0x602   :  { %4360 = vst [vmem:[#allocation11_spill] sm:$0xff] %v3519_v48 }
 0x603   :  { %v2682_v0 = vpop.f32.mrf.mxu0 }
 0x604   :  { %v973_v1 = vadd.f32 %v2682_v0, %v3208_v32 }
 0x605   :  { %v967_v3 = vpop.f32.mrf.mxu0 }
 0x606   :  { %v968_v4 = vadd.f32 %v967_v3, %v3202_v29  ;;  %1112 = vmax.xlane.f32.xlu0 %v973_v1 }
 0x607   :  { %v2685_v21 = vpop.f32.mrf.mxu0 }
 0x608   :  { %1110 = vmax.xlane.f32.xlu1 %v968_v4  ;;  %v983_v31 = vadd.f32 %v2685_v21, %v3220_v38 }
 0x609   :  { %v977_v23 = vpop.f32.mrf.mxu0 }
 0x60a   :  { %v978_v2 = vadd.f32 %v977_v23, %v3213_v34 }
 0x60c   :  { %1114 = vmax.xlane.f32.xlu1 %v978_v2 }
 0x610   :  { %1116 = vmax.xlane.f32.xlu1 %v983_v31 }
 0x68f   :  { %v1113_v36 = vpop.xlane.xlu0 %1112 }
 0x690   :  { %v1119_v26 = vsub.f32 %v973_v1, %v1113_v36 }
 0x691   :  { %v1111_v45 = vpop.xlane.xlu1 %1110 }
 0x692   :  { %v1118_v27 = vsub.f32 %v968_v4, %v1111_v45  ;;  %v1124_v39 = vmul.f32 1.442695, %v1119_v26 }
 0x694   :  { %v1122_v48 = vmul.f32 1.442695, %v1118_v27 }
 0x695   :  { %v1115_v0 = vpop.xlane.xlu1 %1114 }
 0x696   :  { %2906 = vpow2.f32 %v1122_v48  ;;  %v1120_v37 = vsub.f32 %v978_v2, %v1115_v0 }
 0x697   :  { %2908 = vpow2.f32 %v1124_v39 }
 0x698   :  { %v1126_v3 = vmul.f32 1.442695, %v1120_v37 }
 0x699   :  { %v1117_v25 = vpop.xlane.xlu1 %1116 }
 0x69a   :  { %2910 = vpow2.f32 %v1126_v3  ;;  %v1121_v24 = vsub.f32 %v983_v31, %v1117_v25 }
 0x69c   :  { %v1128_v29 = vmul.f32 1.442695, %v1121_v24 }
 0x69e   :  { %2912 = vpow2.f32 %v1128_v29 }
 0x6a3   :  { %v2907_v23 = vpop.eup %2906 }
 0x6a4   :  { %1130 = vadd.xlane.f32.xlu1 %v2907_v23  ;;  %v2909_v21 = vpop.eup %2908 }
 0x6a7   :  { %v2911_v34 = vpop.eup %2910 }
 0x6a8   :  { %1132 = vadd.xlane.f32.xlu1 %v2909_v21  ;;  %1134 = vadd.xlane.f32.xlu0 %v2911_v34 }
 0x6ab   :  { %v2913_v1 = vpop.eup %2912 }
 0x6ac   :  { %1136 = vadd.xlane.f32.xlu1 %v2913_v1 }
 0x72d   :  { %v1131_v27 = vpop.xlane.xlu1 %1130 }
 0x72e   :  { %2914 = vrcp.f32 %v1131_v27 }
 0x731   :  { %v1135_v26 = vpop.xlane.xlu0 %1134  ;;  %v1133_v45 = vpop.xlane.xlu1 %1132 }
 0x732   :  { %2916 = vrcp.f32 %v1135_v26 }
 0x733   :  { %2918 = vrcp.f32 %v1133_v45 }
 0x735   :  { %v1137_v37 = vpop.xlane.xlu1 %1136 }
 0x736   :  { %2920 = vrcp.f32 %v1137_v37 }
 0x73b   :  { %v2915_v39 = vpop.eup %2914 }
 0x73c   :  { %v1139_v25 = vmul.f32 %v2915_v39, %v2907_v23 }
 0x73e   :  { %v1146_v24 = vsub.f32 %v1139_v25, %v3365_v47 }
 0x73f   :  { %v2917_v29 = vpop.eup %2916 }
 0x740   :  { %v2919_v48 = vpop.eup %2918  ;;  %v1150_v4 = vmul.f32 %v1146_v24, %v3368_v49  ;;  %v1143_v2 = vmul.f32 %v2917_v29, %v2911_v34 }
 0x741   :  { %v1141_v31 = vmul.f32 %v2919_v48, %v2909_v21 }
 0x742   :  { %2718 = vmatprep.mubr.f32.mxu1 %v1150_v4  ;;  %v1148_v36 = vsub.f32 %v1143_v2, %v3380_v55 }
 0x743   :  { %v2921_v0 = vpop.eup %2920  ;;  %v1147_v3 = vsub.f32 %v1141_v31, %v3374_v52 }
 0x744   :  { %v1152_v27 = vmul.f32 %v1148_v36, %v3384_v19  ;;  %v1145_v26 = vmul.f32 %v2921_v0, %v2913_v1 }
 0x745   :  { %v1151_v45 = vmul.f32 %v1147_v3, %v3360_v46 }
 0x746   :  { %v1149_v23 = vsub.f32 %v1145_v26, %v3391_v58 }
 0x747   :  { %2719 = vmatmul.mubr.f32.vlgmr.msra.gmra.mxu1 %v1151_v45 }
 0x748   :  { %2721 = vmatprep.mubr.f32.mxu1 %v1152_v27  ;;  %v1153_v37 = vmul.f32 %v1149_v23, %v3397_v40 }
 0x74b   :  { %2722 = vmatmul.mubr.f32.gmra.mxu1 %v1153_v37 }
 0x74c   :  { %2732 = vmatprep.mubr.msk.f32.mxu1 %vm106_vm0, %v3410_v60 }
 0x807   :  { %v2720_v34 = vpop.f32.mrf.mxu1 }
 0x809   :  { %v1220_v21 = vpop.f32.mrf.mxu1 }
 0x80b   :  { %v2723_v39 = vpop.f32.mrf.mxu1 }
 0x80c   :  { %2724 = vmatprep.subr.mxu1 %v2723_v39 }
 0x80d   :  { %v1230_v25 = vpop.f32.mrf.mxu1  ;;  %2725 = vmatpush3.msra.mxu1 %v2723_v39  ;;  %v3640_v39 = vld [vmem:[%s4341_s5] sm:$0xff] }
 0x80e   :  { %2726 = vmatprep.subr.mxu1 %v1230_v25 }
 0x80f   :  { %2727 = vmatpush3.msra.mxu1 %v1230_v25  ;;  %v4363_v25 = vld [vmem:[#allocation2_spill] sm:$0xff] }
 0x810   :  { %2728 = vmatprep.subr.mxu1 %v2720_v34 }
 0x811   :  { %2729 = vmatpush3.msra.mxu1 %v2720_v34  ;;  %v3635_v34 = vld [vmem:[%s4341_s5 + $0x8] sm:$0xff] }
 0x812   :  { %2730 = vmatprep.subr.mxu1 %v1220_v21 }
 0x813   :  { %2731 = vmatpush3.msra.mxu1 %v1220_v21 }
 0x814   :  { %2733 = vmatmul.mubr.msk.f32.vlgmr.msra.gmra.mxu1 %vm106_vm0, %v3417_v54  ;;  %2758 = vmatprep.subr.mxu1 %v3105_v5 }
 0x815   :  { %2735 = vmatprep.mubr.msk.f32.mxu1 %vm106_vm0, %v3422_v56  ;;  %2759 = vmatpush3.msra.mxu1 %v3105_v5 }
 0x816   :  { %2760 = vmatprep.subr.mxu1 %v3110_v6 }
 0x817   :  { %2761 = vmatpush3.msra.mxu1 %v3110_v6 }
 0x818   :  { %2736 = vmatmul.mubr.msk.f32.gmra.mxu1 %vm106_vm0, %v3431_v57  ;;  %2762 = vmatprep.subr.mxu1 %v3172_v14 }
 0x819   :  { %2763 = vmatpush3.msra.mxu1 %v3172_v14 }
 0x81a   :  { %2764 = vmatprep.subr.mxu1 %v3179_v15 }
 0x81b   :  { %2765 = vmatpush3.msra.mxu1 %v3179_v15 }
 0x8d4   :  { %v2734_v1 = vpop.f32.mrf.mxu1 }
 0x8d5   :  { %v1329_v2 = vmul.f32 0.025, %v2734_v1  ;;  %v3644_v1 = vadd.f32 %v4363_v25, %v3635_v34 }
 0x8d6   :  { %v1305_v24 = vpop.f32.mrf.mxu1 }
 0x8d7   :  { %v1328_v36 = vmul.f32 0.025, %v1305_v24  ;;  %v3558_v14 = vsub.f32 %v3446_v51, %v1329_v2  ;;  %v4364_v24 = vld [vmem:[#allocation3_spill] sm:$0xff]  ;;  %v4366_v2 = vld [vmem:[#allocation9_spill] sm:$0xff] }
 0x8d8   :  { %v2737_v29 = vpop.f32.mrf.mxu1 }
 0x8d9   :  { %v1331_v48 = vmul.f32 0.025, %v2737_v29  ;;  %v3563_v15 = vsub.f32 %v3451_v53, %v1328_v36  ;;  %v3648_v29 = vadd.f32 %v4364_v24, %v3640_v39 }
 0x8da   :  { %v1315_v4 = vpop.f32.mrf.mxu1 }
 0x8db   :  { %v3550_v31 = vsub.f32 %v3438_v59, %v1331_v48  ;;  %v1330_v6 = vmul.f32 0.025, %v1315_v4  ;;  %v4365_v48 = vld [vmem:[#allocation8_spill] sm:$0xff] }
 0x8dc   :  { %v3653_v4 = vadd.f32 %v4365_v48, %v3635_v34 }
 0x8dd   :  { %v3553_v0 = vsub.f32 %v3441_v50, %v1330_v6  ;;  %2738 = vmatprep.subr.mxu0 %v3550_v31  ;;  %v3658_v6 = vadd.f32 %v4366_v2, %v3640_v39 }
 0x8de   :  { %2739 = vmatpush3.msra.mxu0 %v3550_v31 }
 0x8df   :  { %2740 = vmatprep.subr.mxu0 %v3553_v0 }
 0x8e0   :  { %2741 = vmatpush3.msra.mxu0 %v3553_v0 }
 0x8e1   :  { %2742 = vmatprep.subr.mxu0 %v3558_v14 }
 0x8e2   :  { %2743 = vmatpush3.msra.mxu0 %v3558_v14 }
 0x8e3   :  { %2744 = vmatprep.subr.mxu0 %v3563_v15 }
 0x8e4   :  { %2745 = vmatpush3.msra.mxu0 %v3563_v15 }
 0x8e5   :  { %2747 = vmatmul.mubr.msk.f32.vlgmr.msra.gmra.mxu0 %vm106_vm0, %v3118_v7  ;;  %2778 = vmatprep.subr.mxu0 %v3226_v41 }
 0x8e6   :  { %2749 = vmatprep.mubr.msk.f32.mxu0 %vm106_vm0, %v3125_v8  ;;  %2779 = vmatpush3.msra.mxu0 %v3226_v41 }
 0x8e7   :  { %2780 = vmatprep.subr.mxu0 %v3231_v42 }
 0x8e8   :  { %2781 = vmatpush3.msra.mxu0 %v3231_v42 }
 0x8e9   :  { %2750 = vmatmul.mubr.msk.f32.gmra.mxu0 %vm106_vm0, %v3137_v9  ;;  %2782 = vmatprep.subr.mxu0 %v3238_v43 }
 0x8ea   :  { %2752 = vmatprep.mubr.msk.f32.mxu0 %vm106_vm0, %v3142_v10  ;;  %2783 = vmatpush3.msra.mxu0 %v3238_v43 }
 0x8eb   :  { %2784 = vmatprep.subr.mxu0 %v3245_v44 }
 0x8ec   :  { %2785 = vmatpush3.msra.mxu0 %v3245_v44 }
 0x8ed   :  { %2753 = vmatmul.mubr.msk.f32.gmra.mxu0 %vm106_vm0, %v3151_v11  ;;  %2786 = vmatprep.subr.mxu0 %v3266_v61 }
 0x8ee   :  { %2755 = vmatprep.mubr.msk.f32.mxu0 %vm106_vm0, %v3156_v12  ;;  %2787 = vmatpush3.msra.mxu0 %v3266_v61 }
 0x8ef   :  { %2788 = vmatprep.subr.mxu0 %v3271_v62 }
 0x8f0   :  { %2789 = vmatpush3.msra.mxu0 %v3271_v62 }
 0x8f1   :  { %2756 = vmatmul.mubr.msk.f32.gmra.mxu0 %vm106_vm0, %v3165_v13  ;;  %2790 = vmatprep.subr.mxu0 %v3280_v63 }
 0x8f2   :  { %2791 = vmatpush3.msra.mxu0 %v3280_v63 }
 0x8f3   :  { %2792 = vmatprep.subr.mxu0 %v3286_v16 }
 0x8f4   :  { %2793 = vmatpush3.msra.mxu0 %v3286_v16  ;;  %v4361_v16 = vld [vmem:[#allocation6_spill] sm:$0xff] }
 0x8f5   :  { %2794 = vmatprep.subr.mxu0 %v3294_v17 }
 0x8f6   :  { %2795 = vmatpush3.msra.mxu0 %v3294_v17 }
 0x8f7   :  { %2796 = vmatprep.subr.mxu0 %v3299_v18 }
 0x8f8   :  { %2797 = vmatpush3.msra.mxu0 %v3299_v18 }
 0x8f9   :  { %2798 = vmatprep.subr.mxu0 %v3311_v20 }
 0x8fa   :  { %2799 = vmatpush3.msra.mxu0 %v3311_v20 }
 0x8fb   :  { %2800 = vmatprep.subr.mxu0 %v3321_v22 }
 0x8fc   :  { %2801 = vmatpush3.msra.mxu0 %v3321_v22 }
 0x8fd   :  { %2802 = vmatprep.subr.mxu0 %v3331_v28 }
 0x8fe   :  { %2803 = vmatpush3.msra.mxu0 %v3331_v28  ;;  %v4362_v28 = vld [vmem:[#allocation7_spill] sm:$0xff] }
 0x8ff   :  { %2804 = vmatprep.subr.mxu0 %v3338_v30 }
 0x900   :  { %2805 = vmatpush3.msra.mxu0 %v3338_v30 }
 0x901   :  { %2806 = vmatprep.subr.mxu0 %v3348_v33 }
 0x902   :  { %2807 = vmatpush3.msra.mxu0 %v3348_v33 }
 0x903   :  { %2808 = vmatprep.subr.mxu0 %v3355_v35 }
 0x904   :  { %2809 = vmatpush3.msra.mxu0 %v3355_v35 }
 0x905   :  { %2850 = vmatprep.subr.mxu0 %v3105_v5 }
 0x9a5   :  { %v2748_v7 = vpop.f32.mrf.mxu0 }
 0x9a7   :  { %v1402_v8 = vpop.f32.mrf.mxu0 }
 0x9a8   :  { %2766 = vmatprep.mubr.msk.f32.mxu1 %vm106_vm0, %v1402_v8  ;;  %v3672_v8 = vld [vmem:[%s4341_s5 + $0x10] sm:$0xff] }
 0x9a9   :  { %v2751_v9 = vpop.f32.mrf.mxu0  ;;  %2767 = vmatmul.mubr.msk.f32.vlgmr.msra.gmra.mxu1 %vm106_vm0, %v2748_v7 }
 0x9ab   :  { %v1412_v10 = vpop.f32.mrf.mxu0 }
 0x9ac   :  { %2769 = vmatprep.mubr.msk.f32.mxu1 %vm106_vm0, %v1412_v10 }
 0x9ad   :  { %v2754_v11 = vpop.f32.mrf.mxu0  ;;  %2770 = vmatmul.mubr.msk.f32.gmra.mxu1 %vm106_vm0, %v2751_v9  ;;  %v4367_v9 = vld [vmem:[#allocation11_spill] sm:$0xff] }
 0x9ae   :  { %v3676_v10 = vadd.f32 %v4367_v9, %v3672_v8 }
 0x9af   :  { %v1422_v12 = vpop.f32.mrf.mxu0 }
 0x9b0   :  { %2772 = vmatprep.mubr.msk.f32.mxu1 %vm106_vm0, %v1422_v12 }
 0x9b1   :  { %v2757_v13 = vpop.f32.mrf.mxu0  ;;  %2773 = vmatmul.mubr.msk.f32.gmra.mxu1 %vm106_vm0, %v2754_v11  ;;  %v4368_v11 = vld [vmem:[#allocation5_spill] sm:$0xff] }
 0x9b2   :  { %v3681_v12 = vadd.f32 %v4368_v11, %v3672_v8  ;;  %v3011_v11 = vld [vmem:[%s4339_s1 + $0x28] sm:$0xff] }
 0x9b3   :  { %v1432_v5 = vpop.f32.mrf.mxu0 }
 0x9b4   :  { %2775 = vmatprep.mubr.msk.f32.mxu1 %vm106_vm0, %v1432_v5  ;;  %v4369_v5 = vld [vmem:[#allocation10_spill] sm:$0xff] }
 0x9b5   :  { %2776 = vmatmul.mubr.msk.f32.gmra.mxu1 %vm106_vm0, %v2757_v13  ;;  %v3687_v13 = vld [vmem:[%s4341_s5 + $0x18] sm:$0xff] }
 0x9b6   :  { %2824 = vmatprep.mubr.msk.f32.mxu1 %vm106_vm0, %v3410_v60 }
 0xa69   :  { %v2768_v41 = vpop.f32.mrf.mxu1 }
 0xa6a   :  { %v3662_v36 = vadd.f32 %v2768_v41, %v3635_v34  ;;  %v3691_v41 = vadd.f32 %v4369_v5, %v3687_v13  ;;  %v3012_v5 = vld [vmem:[%s4339_s1 + $0x30] sm:$0xff] }
 0xa6b   :  { %v1531_v42 = vpop.f32.mrf.mxu1 }
 0xa6c   :  { %v3666_v7 = vadd.f32 %v1531_v42, %v3640_v39 }
 0xa6d   :  { %v3626_v43 = vpop.f32.mrf.mxu1 }
 0xa6f   :  { %v1541_v44 = vpop.f32.mrf.mxu1 }
 0xa70   :  { %v3695_v42 = vadd.f32 %v1541_v44, %v3672_v8 }
 0xa71   :  { %v2774_v61 = vpop.f32.mrf.mxu1 }
 0xa72   :  { %v1557_v62 = vadd.f32 %v2774_v61, %v3208_v32  ;;  %v4370_v61 = vld [vmem:[#allocation4_spill] sm:$0xff] }
 0xa73   :  { %v1551_v63 = vpop.f32.mrf.mxu1 }
 0xa74   :  { %v1552_v17 = vadd.f32 %v1551_v63, %v4361_v16  ;;  %1696 = vmax.xlane.f32.xlu1 %v1557_v62 }
 0xa75   :  { %v2777_v18 = vpop.f32.mrf.mxu1 }
 0xa76   :  { %v1567_v20 = vadd.f32 %v2777_v18, %v3220_v38  ;;  %1694 = vmax.xlane.f32.xlu0 %v1552_v17 }
 0xa77   :  { %v1561_v22 = vpop.f32.mrf.mxu1 }
 0xa78   :  { %v1562_v30 = vadd.f32 %v1561_v22, %v4362_v28  ;;  %1700 = vmax.xlane.f32.xlu1 %v1567_v20 }
 0xa7a   :  { %1698 = vmax.xlane.f32.xlu0 %v1562_v30 }
 0xafd   :  { %v1697_v33 = vpop.xlane.xlu1 %1696 }
 0xafe   :  { %v1703_v35 = vsub.f32 %v1557_v62, %v1697_v33  ;;  %v3701_v62 = vadd.f32 %v4370_v61, %v3687_v13  ;;  %v3013_v61 = vld [vmem:[%s4339_s1 + $0x38] sm:$0xff] }
 0xaff   :  { %v1695_v60 = vpop.xlane.xlu0 %1694 }
 0xb00   :  { %v1708_v59 = vmul.f32 1.442695, %v1703_v35  ;;  %v1702_v50 = vsub.f32 %v1552_v17, %v1695_v60 }
 0xb01   :  { %v1701_v51 = vpop.xlane.xlu1 %1700 }
 0xb02   :  { %2922 = vpow2.f32 %v1708_v59  ;;  %v1706_v32 = vmul.f32 1.442695, %v1702_v50  ;;  %v1705_v53 = vsub.f32 %v1567_v20, %v1701_v51 }
 0xb03   :  { %v1699_v3 = vpop.xlane.xlu0 %1698 }
 0xb04   :  { %2924 = vpow2.f32 %v1706_v32  ;;  %v1712_v27 = vmul.f32 1.442695, %v1705_v53  ;;  %v1704_v26 = vsub.f32 %v1562_v30, %v1699_v3 }
 0xb06   :  { %2926 = vpow2.f32 %v1712_v27  ;;  %v1710_v38 = vmul.f32 1.442695, %v1704_v26  ;;  %v3002_v27 = vld [vmem:[%s4340_s3 + $0x18] sm:$0xff] }
 0xb08   :  { %2928 = vpow2.f32 %v1710_v38  ;;  %v3006_v38 = vld [vmem:[%s4339_s1] sm:$0xff] }
 0xb0f   :  { %v2923_v45 = vpop.eup %2922 }
 0xb10   :  { %1716 = vadd.xlane.f32.xlu1 %v2923_v45 }
 0xb11   :  { %v2925_v23 = vpop.eup %2924 }
 0xb12   :  { %1714 = vadd.xlane.f32.xlu0 %v2925_v23 }
 0xb13   :  { %v2927_v37 = vpop.eup %2926 }
 0xb14   :  { %1720 = vadd.xlane.f32.xlu1 %v2927_v37 }
 0xb15   :  { %v2929_v21 = vpop.eup %2928 }
 0xb16   :  { %1718 = vadd.xlane.f32.xlu0 %v2929_v21 }
 0xb18   :  { %367 = vmax.xlane.f32.xlu1 %v3644_v1 }
 0xb1a   :  { %365 = vmax.xlane.f32.xlu0 %v3648_v29 }
 0xb1c   :  { %988 = vmax.xlane.f32.xlu1 %v3653_v4 }
 0xb1e   :  { %986 = vmax.xlane.f32.xlu0 %v3658_v6 }
 0xb20   :  { %1572 = vmax.xlane.f32.xlu1 %v3662_v36 }
 0xb22   :  { %1570 = vmax.xlane.f32.xlu0 %v3666_v7 }
 0xb24   :  { %990 = vmax.xlane.f32.xlu1 %v3676_v10 }
 0xb26   :  { %369 = vmax.xlane.f32.xlu0 %v3681_v12 }
 0xb28   :  { %992 = vmax.xlane.f32.xlu1 %v3691_v41 }
 0xb2a   :  { %1574 = vmax.xlane.f32.xlu0 %v3695_v42 }
 0xb2e   :  { %371 = vmax.xlane.f32.xlu0 %v3701_v62 }
 0xb99   :  { %v1717_v63 = vpop.xlane.xlu1 %1716 }
 0xb9a   :  { %2930 = vrcp.f32 %v1717_v63 }
 0xb9b   :  { %v1715_v16 = vpop.xlane.xlu0 %1714 }
 0xb9c   :  { %2932 = vrcp.f32 %v1715_v16 }
 0xb9d   :  { %v1721_v17 = vpop.xlane.xlu1 %1720 }
 0xb9e   :  { %2934 = vrcp.f32 %v1721_v17 }
 0xb9f   :  { %v1719_v18 = vpop.xlane.xlu0 %1718 }
 0xba0   :  { %2936 = vrcp.f32 %v1719_v18 }
 0xba7   :  { %v2931_v44 = vpop.eup %2930 }
 0xba8   :  { %v1725_v20 = vmul.f32 %v2931_v44, %v2923_v45  ;;  %v3770_v44 = vpop.xlane.xlu0 %365 }
 0xba9   :  { %v2933_v22 = vpop.eup %2932  ;;  %vm442_vm7 = vcmp.ge.f32.partialorder %v3648_v29, %v3770_v44 }
 0xbaa   :  { %v1723_v28 = vmul.f32 %v2933_v22, %v2925_v23  ;;  %v1731_v33 = vsub.f32 %v1725_v20, %v3374_v52  ;;  %v3004_v52 = vld [vmem:[%s4340_s3 + $0x8] sm:$0xff]  ;;  %v3772_v20 = vpop.xlane.xlu1 %367 }
 0xbab   :  { %v2935_v30 = vpop.eup %2934  ;;  %vm443_vm1 = vcmp.ge.f32.partialorder %v3644_v1, %v3772_v20 }
 0xbac   :  { %v1730_v35 = vsub.f32 %v1723_v28, %v3365_v47  ;;  %v1729_v59 = vmul.f32 %v2935_v30, %v2927_v37  ;;  %v1735_v51 = vmul.f32 %v1731_v33, %v3360_v46  ;;  %v3774_v22 = vpop.xlane.xlu0 %986  ;;  %v373_v33 = vsub.f32 %v3648_v29, %v3770_v44 }
 0xbad   :  { %v2937_v60 = vpop.eup %2936  ;;  %vm1062_vm8 = vcmp.ge.f32.partialorder %v3658_v6, %v3774_v22 }
 0xbae   :  { %v1734_v50 = vmul.f32 %v1730_v35, %v3368_v49  ;;  %v1727_v32 = vmul.f32 %v2937_v60, %v2929_v21  ;;  %v1733_v53 = vsub.f32 %v1729_v59, %v3391_v58  ;;  %v3003_v49 = vld [vmem:[%s4340_s3 + $0x10] sm:$0xff]  ;;  %v3776_v28 = vpop.xlane.xlu1 %988  ;;  %v374_v35 = vsub.f32 %v3644_v1, %v3772_v20 }
 0xbaf   :  { %v377_v60 = vmul.f32 1.442695, %v373_v33  ;;  %v994_v59 = vsub.f32 %v3658_v6, %v3774_v22  ;;  %v76_v33 = vld [vmem:[%s4344_s6 + $0x8] sm:$0xff]  ;;  %vm1063_vm2 = vcmp.ge.f32.partialorder %v3653_v4, %v3776_v28 }
 0xbb0   :  { %2810 = vmatprep.mubr.f32.mxu0 %v1734_v50  ;;  %v1732_v3 = vsub.f32 %v1727_v32, %v3380_v55  ;;  %v1737_v46 = vmul.f32 %v1733_v53, %v3397_v40  ;;  %v3005_v55 = vld [vmem:[%s4340_s3] sm:$0xff]  ;;  %v3778_v30 = vpop.xlane.xlu0 %1570  ;;  %v379_v32 = vmul.f32 1.442695, %v374_v35  ;;  %v995_v53 = vsub.f32 %v3653_v4, %v3776_v28 }
 0xbb1   :  { %2811 = vmatmul.mubr.f32.vlgmr.msra.gmra.mxu0 %v1735_v51  ;;  %2938 = vpow2.f32 %v377_v60  ;;  %v406_v35 = vmul.f32 %v3644_v1, %v76_v33  ;;  %v1027_v60 = vmul.f32 %v3653_v4, %v76_v33  ;;  %vm1646_vm10 = vcmp.ge.f32.partialorder %v3666_v7, %v3778_v30 }
 0xbb2   :  { %2851 = vmatpush3.msra.mxu0 %v3002_v27  ;;  %v1736_v47 = vmul.f32 %v1732_v3, %v3384_v19  ;;  %v3786_v50 = vpop.xlane.xlu1 %1572  ;;  %v998_v3 = vmul.f32 1.442695, %v994_v59  ;;  %v1578_v27 = vsub.f32 %v3666_v7, %v3778_v30  ;;  %2940 = vpow2.f32 %v379_v32 }
 0xbb3   :  { %2852 = vmatprep.subr.mxu0 %v3003_v49  ;;  %v99_v59 = vlaneseq  ;;  %v1611_v32 = vmul.f32 %v3662_v36, %v76_v33  ;;  %vm1647_vm3 = vcmp.ge.f32.partialorder %v3662_v36, %v3786_v50 }
 0xbb4   :  { %2853 = vmatpush3.msra.mxu0 %v3003_v49  ;;  %2813 = vmatprep.mubr.f32.mxu0 %v1736_v47  ;;  %v3788_v51 = vpop.xlane.xlu0 %369  ;;  %2942 = vpow2.f32 %v998_v3 }
 0xbb5   :  { %2854 = vmatprep.subr.mxu0 %v3004_v52  ;;  %2814 = vmatmul.mubr.f32.gmra.mxu0 %v1737_v46  ;;  %vm444_vm13 = vcmp.ge.f32.partialorder %v3681_v12, %v3788_v51 }
 0xbb6   :  { %2855 = vmatpush3.msra.mxu0 %v3004_v52  ;;  %v3794_v49 = vpop.xlane.xlu1 %990  ;;  %v1000_v52 = vmul.f32 1.442695, %v995_v53  ;;  %v100_v53 = vand.u32 127, %v99_v59 }
 0xbb7   :  { %2856 = vmatprep.subr.mxu0 %v3005_v55  ;;  %vm1064_vm5 = vcmp.ge.f32.partialorder %v3676_v10, %v3794_v49 }
 0xbb8   :  { %2857 = vmatpush3.msra.mxu0 %v3005_v55  ;;  %v1579_v55 = vsub.f32 %v3662_v36, %v3786_v50  ;;  %2944 = vpow2.f32 %v1000_v52 }
 0xc71   :  { %v2812_v19 = vpop.f32.mrf.mxu0 }
 0xc73   :  { %v1804_v58 = vpop.f32.mrf.mxu0 }
 0xc75   :  { %v2815_v26 = vpop.f32.mrf.mxu0 }
 0xc76   :  { %2816 = vmatprep.subr.mxu1 %v2815_v26 }
 0xc77   :  { %v1814_v40 = vpop.f32.mrf.mxu0  ;;  %2817 = vmatpush3.msra.mxu1 %v2815_v26  ;;  %v1582_v26 = vmul.f32 1.442695, %v1578_v27  ;;  %v3842_v27 = vcvt.s32.f32 %v100_v53 }
 0xc78   :  { %2818 = vmatprep.subr.mxu1 %v1814_v40 }
 0xc79   :  { %2819 = vmatpush3.msra.mxu1 %v1814_v40  ;;  %v375_v40 = vsub.f32 %v3681_v12, %v3788_v51  ;;  %2946 = vpow2.f32 %v1582_v26  ;;  %v1067_v52 = vsel %vm1063_vm2, %v3842_v27, 128.0  ;;  %v448_v53 = vsel %vm444_vm13, %v3842_v27, 128.0 }
 0xc7a   :  { %2820 = vmatprep.subr.mxu1 %v2812_v19 }
 0xc7b   :  { %2821 = vmatpush3.msra.mxu1 %v2812_v19  ;;  %v3801_v19 = vpop.xlane.xlu0 %1574 }
 0xc7c   :  { %2822 = vmatprep.subr.mxu1 %v1804_v58  ;;  %vm1648_vm14 = vcmp.ge.f32.partialorder %v3695_v42, %v3801_v19 }
 0xc7d   :  { %2823 = vmatpush3.msra.mxu1 %v1804_v58 }
 0xc7e   :  { %2825 = vmatmul.mubr.msk.f32.vlgmr.msra.gmra.mxu1 %vm106_vm0, %v3417_v54 }
 0xc7f   :  { %2827 = vmatprep.mubr.msk.f32.mxu1 %vm106_vm0, %v3422_v56 }
 0xc82   :  { %2828 = vmatmul.mubr.msk.f32.gmra.mxu1 %vm106_vm0, %v3431_v57 }
 0xc83   :  { %2838 = vmatprep.mubr.msk.f32.mxu1 %vm106_vm0, %v3006_v38 }
 0xd3e   :  { %v2826_v45 = vpop.f32.mrf.mxu1 }
 0xd3f   :  { %v1913_v24 = vmul.f32 0.025, %v2826_v45  ;;  %v3812_v45 = vadd.f32 %v3626_v43, %v3687_v13 }
 0xd40   :  { %v1889_v23 = vpop.f32.mrf.mxu1 }
 0xd41   :  { %v1912_v2 = vmul.f32 0.025, %v1889_v23  ;;  %v1917_v57 = vsub.f32 %v3558_v14, %v1913_v24  ;;  %v3009_v14 = vld [vmem:[%s4339_s1 + $0x18] sm:$0xff]  ;;  %v1584_v23 = vmul.f32 1.442695, %v1579_v55  ;;  %v3816_v24 = vpop.xlane.xlu1 %992  ;;  %v1651_v55 = vsel %vm1647_vm3, %v3842_v27, 128.0 }
 0xd42   :  { %v2829_v37 = vpop.f32.mrf.mxu1  ;;  %vm1065_vm9 = vcmp.ge.f32.partialorder %v3691_v41, %v3816_v24 }
 0xd43   :  { %v1915_v21 = vmul.f32 0.025, %v2829_v37  ;;  %v1916_v9 = vsub.f32 %v3563_v15, %v1912_v2  ;;  %v3010_v15 = vld [vmem:[%s4339_s1 + $0x20] sm:$0xff]  ;;  %v996_v37 = vsub.f32 %v3676_v10, %v3794_v49  ;;  %2948 = vpow2.f32 %v1584_v23 }
 0xd44   :  { %v1899_v25 = vpop.f32.mrf.mxu1 }
 0xd45   :  { %v1919_v54 = vsub.f32 %v3550_v31, %v1915_v21  ;;  %v1914_v48 = vmul.f32 0.025, %v1899_v25  ;;  %v3007_v31 = vld [vmem:[%s4339_s1 + $0x8] sm:$0xff]  ;;  %v381_v25 = vmul.f32 1.442695, %v375_v40 }
 0xd46   :  { %v1002_v2 = vmul.f32 1.442695, %v996_v37 }
 0xd47   :  { %v1918_v56 = vsub.f32 %v3553_v0, %v1914_v48  ;;  %2830 = vmatprep.subr.mxu1 %v1919_v54  ;;  %v3008_v0 = vld [vmem:[%s4339_s1 + $0x10] sm:$0xff]  ;;  %v3823_v48 = vpop.xlane.xlu0 %371  ;;  %2950 = vpow2.f32 %v381_v25 }
 0xd48   :  { %2831 = vmatpush3.msra.mxu1 %v1919_v54  ;;  %2952 = vpow2.f32 %v1002_v2  ;;  %vm445_vm15 = vcmp.ge.f32.partialorder %v3701_v62, %v3823_v48 }
 0xd49   :  { %2832 = vmatprep.subr.mxu1 %v1918_v56 }
 0xd4a   :  { %2833 = vmatpush3.msra.mxu1 %v1918_v56  ;;  %v997_v56 = vsub.f32 %v3691_v41, %v3816_v24 }
 0xd4b   :  { %2834 = vmatprep.subr.mxu1 %v1917_v57 }
 0xd4c   :  { %2835 = vmatpush3.msra.mxu1 %v1917_v57 }
 0xd4d   :  { %2836 = vmatprep.subr.mxu1 %v1916_v9 }
 0xd4e   :  { %2837 = vmatpush3.msra.mxu1 %v1916_v9  ;;  %v2939_v9 = vpop.eup %2938 }
 0xd4f   :  { %2839 = vmatmul.mubr.msk.f32.vlgmr.msra.gmra.mxu1 %vm106_vm0, %v3007_v31  ;;  %v2941_v31 = vpop.eup %2940 }
 0xd50   :  { %2841 = vmatprep.mubr.msk.f32.mxu1 %vm106_vm0, %v3008_v0 }
 0xd53   :  { %2842 = vmatmul.mubr.msk.f32.gmra.mxu1 %vm106_vm0, %v3009_v14  ;;  %v2943_v14 = vpop.eup %2942 }
 0xd54   :  { %2844 = vmatprep.mubr.msk.f32.mxu1 %vm106_vm0, %v3010_v15  ;;  %v2945_v15 = vpop.eup %2944 }
 0xd57   :  { %2845 = vmatmul.mubr.msk.f32.gmra.mxu1 %vm106_vm0, %v3011_v11  ;;  %v2947_v11 = vpop.eup %2946 }
 0xd58   :  { %2847 = vmatprep.mubr.msk.f32.mxu1 %vm106_vm0, %v3012_v5  ;;  %v2949_v5 = vpop.eup %2948 }
 0xd5b   :  { %2848 = vmatmul.mubr.msk.f32.gmra.mxu1 %vm106_vm0, %v3013_v61  ;;  %v2951_v61 = vpop.eup %2950 }
 0xe0f   :  { %v2840_v63 = vpop.f32.mrf.mxu1 }
 0xe11   :  { %v1986_v16 = vpop.f32.mrf.mxu1 }
 0xe12   :  { %2858 = vmatprep.mubr.msk.f32.mxu0 %vm106_vm0, %v1986_v16 }
 0xe13   :  { %v2843_v17 = vpop.f32.mrf.mxu1  ;;  %2859 = vmatmul.mubr.msk.f32.vlgmr.msra.gmra.mxu0 %vm106_vm0, %v2840_v63  ;;  %v2953_v63 = vpop.eup %2952 }
 0xe15   :  { %v1996_v18 = vpop.f32.mrf.mxu1 }
 0xe16   :  { %2861 = vmatprep.mubr.msk.f32.mxu0 %vm106_vm0, %v1996_v18 }
 0xe17   :  { %2862 = vmatmul.mubr.msk.f32.gmra.mxu0 %vm106_vm0, %v2843_v17 }
 0xed3   :  { %v2860_v47 = vpop.f32.mrf.mxu0 }
 0xed4   :  { %v3797_v46 = vadd.f32 %v2860_v47, %v3635_v34  ;;  %v447_v47 = vsel %vm443_vm1, %v3842_v27, 128.0 }
 0xed5   :  { %v2115_v58 = vpop.f32.mrf.mxu0 }
 0xed6   :  { %v3806_v38 = vadd.f32 %v2115_v58, %v3640_v39  ;;  %2152 = vmax.xlane.f32.xlu1 %v3797_v46  ;;  %v1580_v39 = vsub.f32 %v3695_v42, %v3801_v19  ;;  %v2191_v3 = vmul.f32 %v3797_v46, %v76_v33  ;;  %v3856_v58 = vld [vmem:[%s4344_s6 + $0x10] sm:$0xff] }
 0xed7   :  { %v2863_v34 = vpop.f32.mrf.mxu0  ;;  %v1028_v1 = vmul.f32 %v3676_v10, %v3856_v58  ;;  %v78_v10 = vld [vmem:[%s4344_s6 + $0x18] sm:$0xff] }
 0xed8   :  { %2150 = vmax.xlane.f32.xlu0 %v3806_v38  ;;  %v3826_v43 = vadd.f32 %v2863_v34, %v3687_v13  ;;  %v1586_v57 = vmul.f32 1.442695, %v1580_v39  ;;  %v1004_v13 = vmul.f32 1.442695, %v997_v56 }
 0xed9   :  { %v2125_v21 = vpop.f32.mrf.mxu0 }
 0xeda   :  { %v3821_v54 = vadd.f32 %v2125_v21, %v3672_v8  ;;  %v376_v8 = vsub.f32 %v3701_v62, %v3823_v48  ;;  %2954 = vpow2.f32 %v1586_v57 }
 0xedb   :  { %2956 = vpow2.f32 %v1004_v13 }
 0xedc   :  { %1576 = vmax.xlane.f32.xlu0 %v3812_v45  ;;  %2154 = vmax.xlane.f32.xlu1 %v3821_v54  ;;  %v383_v0 = vmul.f32 1.442695, %v376_v8  ;;  %v2192_v4 = vmul.f32 %v3821_v54, %v3856_v58 }
 0xede   :  { %2958 = vpow2.f32 %v383_v0 }
 0xee0   :  { %2156 = vmax.xlane.f32.xlu1 %v3826_v43  ;;  %385 = vadd.xlane.f32.xlu0 %v2939_v9 }
 0xee4   :  { %387 = vadd.xlane.f32.xlu1 %v2941_v31  ;;  %1006 = vadd.xlane.f32.xlu0 %v2943_v14  ;;  %v75_v31 = vld [vmem:[%s4344_s6] sm:$0xff] }
 0xee5   :  { %v405_v14 = vmul.f32 %v3648_v29, %v75_v31 }
 0xee7   :  { %v2955_v16 = vpop.eup %2954 }
 0xee8   :  { %1008 = vadd.xlane.f32.xlu1 %v2945_v15  ;;  %1590 = vadd.xlane.f32.xlu0 %v2947_v11  ;;  %v2957_v17 = vpop.eup %2956  ;;  %v1026_v11 = vmul.f32 %v3658_v6, %v75_v31  ;;  %v1650_v6 = vsel %vm1646_vm10, %v3842_v27, 128.0 }
 0xeeb   :  { %v2959_v18 = vpop.eup %2958 }
 0xeec   :  { %1592 = vadd.xlane.f32.xlu1 %v2949_v5  ;;  %389 = vadd.xlane.f32.xlu0 %v2951_v61  ;;  %v1068_v5 = vsel %vm1064_vm5, %v3842_v27, 128.0  ;;  %v1610_v61 = vmul.f32 %v3666_v7, %v75_v31  ;;  %v1612_v7 = vmul.f32 %v3695_v42, %v3856_v58 }
 0xef0   :  { %1010 = vadd.xlane.f32.xlu1 %v2953_v63  ;;  %1594 = vadd.xlane.f32.xlu0 %v2955_v16  ;;  %v2190_v16 = vmul.f32 %v3806_v38, %v75_v31 }
 0xef4   :  { %1012 = vadd.xlane.f32.xlu1 %v2957_v17  ;;  %391 = vadd.xlane.f32.xlu0 %v2959_v18  ;;  %v1029_v17 = vmul.f32 %v3691_v41, %v78_v10  ;;  %v446_v18 = vsel %vm442_vm7, %v3842_v27, 128.0  ;;  %v407_v41 = vmul.f32 %v3681_v12, %v3856_v58  ;;  %v449_v12 = vsel %vm445_vm15, %v3842_v27, 128.0 }
 0xef8   :  { %411 = vadd.xlane.f32.xlu1 %v406_v35  ;;  %v1066_v35 = vsel %vm1062_vm8, %v3842_v27, 128.0 }
 0xefc   :  { %1032 = vadd.xlane.f32.xlu1 %v1027_v60  ;;  %v1069_v60 = vsel %vm1065_vm9, %v3842_v27, 128.0 }
 0xf00   :  { %1616 = vadd.xlane.f32.xlu1 %v1611_v32 }
 0xf04   :  { %2196 = vadd.xlane.f32.xlu1 %v2191_v3  ;;  %v1652_v3 = vsel %vm1648_vm14, %v3842_v27, 128.0 }
 0xf08   :  { %452 = vmin.xlane.f32.xlu1 %v447_v47  ;;  %v408_v47 = vmul.f32 %v3701_v62, %v78_v10 }
 0xf0c   :  { %1072 = vmin.xlane.f32.xlu1 %v1067_v52 }
 0xf10   :  { %1656 = vmin.xlane.f32.xlu1 %v1651_v55 }
 0xf14   :  { %1034 = vadd.xlane.f32.xlu1 %v1028_v1 }
 0xf18   :  { %2198 = vadd.xlane.f32.xlu1 %v2192_v4  ;;  %v2846_v4 = vpop.f32.mrf.mxu1 }
 0xf5f   :  { %v3862_v26 = vpop.xlane.xlu1 %2152 }
 0xf60   :  { %v2159_v36 = vsub.f32 %v3797_v46, %v3862_v26  ;;  %vm2227_vm4 = vcmp.ge.f32.partialorder %v3797_v46, %v3862_v26 }
 0xf61   :  { %v3868_v40 = vpop.xlane.xlu0 %2150  ;;  %v2231_v34 = vsel %vm2227_vm4, %v3842_v27, 128.0 }
 0xf62   :  { %v2164_v23 = vmul.f32 1.442695, %v2159_v36  ;;  %2236 = vmin.xlane.f32.xlu1 %v2231_v34  ;;  %v2158_v33 = vsub.f32 %v3806_v38, %v3868_v40  ;;  %vm2226_vm12 = vcmp.ge.f32.partialorder %v3806_v38, %v3868_v40  ;;  %v1613_v38 = vmul.f32 %v3812_v45, %v78_v10  ;;  %v2006_v36 = vpop.f32.mrf.mxu1 }
 0xf63   :  { %v2230_v32 = vsel %vm2226_vm12, %v3842_v27, 128.0  ;;  %2864 = vmatprep.mubr.msk.f32.mxu0 %vm106_vm0, %v2006_v36  ;;  %v3987_v36 = vld [vmem:[%s4343_s7 + $0x8] sm:$0xff] }
 0xf64   :  { %2960 = vpow2.f32 %v2164_v23  ;;  %v2162_v29 = vmul.f32 1.442695, %v2158_v33  ;;  %v2849_v23 = vpop.f32.mrf.mxu1  ;;  %2865 = vmatmul.mubr.msk.f32.gmra.mxu0 %vm106_vm0, %v2846_v4 }
 0xf65   :  { %v3871_v37 = vpop.xlane.xlu1 %2154  ;;  %v3873_v21 = vpop.xlane.xlu0 %1576 }
 0xf66   :  { %v1581_v25 = vsub.f32 %v3812_v45, %v3873_v21  ;;  %v2160_v46 = vsub.f32 %v3821_v54, %v3871_v37  ;;  %vm2228_vm6 = vcmp.ge.f32.partialorder %v3821_v54, %v3871_v37  ;;  %v2193_v54 = vmul.f32 %v3826_v43, %v78_v10  ;;  %v2016_v62 = vpop.f32.mrf.mxu1 }
 0xf67   :  { %v2232_v63 = vsel %vm2228_vm6, %v3842_v27, 128.0  ;;  %vm1649_vm1 = vcmp.ge.f32.partialorder %v3812_v45, %v3873_v21  ;;  %2867 = vmatprep.mubr.msk.f32.mxu0 %vm106_vm0, %v2016_v62 }
 0xf68   :  { %v1588_v39 = vmul.f32 1.442695, %v1581_v25  ;;  %v2166_v8 = vmul.f32 1.442695, %v2160_v46  ;;  %v1653_v42 = vsel %vm1649_vm1, %v3842_v27, 128.0  ;;  %2868 = vmatmul.mubr.msk.f32.gmra.mxu0 %vm106_vm0, %v2849_v23  ;;  %vm425_vm0 = vcmask 7168  }
 0xf69   :  { %v3877_v2 = vpop.xlane.xlu1 %2156  ;;  %v386_v25 = vpop.xlane.xlu0 %385 }
 0xf6a   :  { %v2161_v56 = vsub.f32 %v3826_v43, %v3877_v2  ;;  %2962 = vpow2.f32 %v1588_v39  ;;  %vm2229_vm11 = vcmp.ge.f32.partialorder %v3826_v43, %v3877_v2 }
 0xf6b   :  { %v2233_v59 = vsel %vm2229_vm11, %v3842_v27, 128.0 }
 0xf6c   :  { %v2168_v57 = vmul.f32 1.442695, %v2161_v56 }
 0xf6d   :  { %v388_v52 = vpop.xlane.xlu1 %387  ;;  %v1007_v46 = vpop.xlane.xlu0 %1006 }
 0xf6e   :  { %2964 = vpow2.f32 %v2168_v57 }
 0xf6f   :  { %2966 = vpow2.f32 %v2166_v8 }
 0xf70   :  { %2968 = vpow2.f32 %v2162_v29 }
 0xf71   :  { %v2961_v9 = vpop.eup %2960  ;;  %v1009_v55 = vpop.xlane.xlu1 %1008  ;;  %2970 = vlog2.f32 %v388_v52 }
 0xf72   :  { %2172 = vadd.xlane.f32.xlu1 %v2961_v9  ;;  %v1591_v57 = vpop.xlane.xlu0 %1590  ;;  %2972 = vlog2.f32 %v1009_v55 }
 0xf75   :  { %v1593_v58 = vpop.xlane.xlu1 %1592 }
 0xf76   :  { %v390_v9 = vpop.xlane.xlu0 %389  ;;  %2974 = vlog2.f32 %v1593_v58 }
 0xf77   :  { %v2963_v13 = vpop.eup %2962  ;;  %2976 = vlog2.f32 %v1007_v46 }
 0xf78   :  { %1596 = vadd.xlane.f32.xlu0 %v2963_v13  ;;  %2978 = vlog2.f32 %v386_v25 }
 0xf79   :  { %v1011_v1 = vpop.xlane.xlu1 %1010  ;;  %2980 = vlog2.f32 %v1591_v57 }
 0xf7a   :  { %v1595_v31 = vpop.xlane.xlu0 %1594  ;;  %2982 = vlog2.f32 %v390_v9 }
 0xf7b   :  { %v2965_v0 = vpop.eup %2964  ;;  %2984 = vlog2.f32 %v1011_v1 }
 0xf7c   :  { %2176 = vadd.xlane.f32.xlu1 %v2965_v0  ;;  %409 = vadd.xlane.f32.xlu0 %v405_v14  ;;  %v2967_v15 = vpop.eup %2966  ;;  %2986 = vlog2.f32 %v1595_v31 }
 0xf7d   :  { %v2969_v43 = vpop.eup %2968  ;;  %v1013_v34 = vpop.xlane.xlu1 %1012 }
 0xf7e   :  { %v392_v14 = vpop.xlane.xlu0 %391 }
 0xf80   :  { %2174 = vadd.xlane.f32.xlu1 %v2967_v15  ;;  %1030 = vadd.xlane.f32.xlu0 %v1026_v11 }
 0xf81   :  { %v3943_v45 = vpop.xlane.xlu1 %411 }
 0xf84   :  { %1074 = vmin.xlane.f32.xlu1 %v1068_v5  ;;  %1614 = vadd.xlane.f32.xlu0 %v1610_v61 }
 0xf85   :  { %v3945_v27 = vpop.xlane.xlu1 %1032 }
 0xf88   :  { %2238 = vmin.xlane.f32.xlu1 %v2232_v63  ;;  %2194 = vadd.xlane.f32.xlu0 %v2190_v16 }
 0xf89   :  { %v3947_v39 = vpop.xlane.xlu1 %1616 }
 0xf8c   :  { %1036 = vadd.xlane.f32.xlu1 %v1029_v17  ;;  %450 = vmin.xlane.f32.xlu0 %v446_v18 }
 0xf8d   :  { %v3949_v56 = vpop.xlane.xlu1 %2196 }
 0xf90   :  { %2200 = vadd.xlane.f32.xlu1 %v2193_v54  ;;  %1070 = vmin.xlane.f32.xlu0 %v1066_v35 }
 0xf91   :  { %v3951_v8 = vpop.xlane.xlu1 %452 }
 0xf94   :  { %1076 = vmin.xlane.f32.xlu1 %v1069_v60  ;;  %1654 = vmin.xlane.f32.xlu0 %v1650_v6  ;;  %v2971_v60 = vpop.eup %2970 }
 0xf95   :  { %v3953_v13 = vpop.xlane.xlu1 %1072  ;;  %v2973_v6 = vpop.eup %2972 }
 0xf98   :  { %2240 = vmin.xlane.f32.xlu1 %v2233_v59  ;;  %413 = vadd.xlane.f32.xlu0 %v407_v41  ;;  %v2975_v41 = vpop.eup %2974 }
 0xf99   :  { %v3955_v0 = vpop.xlane.xlu1 %1656 }
 0xf9c   :  { %1618 = vadd.xlane.f32.xlu0 %v1612_v7  ;;  %v396_v7 = vmul.f32 0.6931472, %v2971_v60 }
 0xf9d   :  { %v3957_v11 = vpop.xlane.xlu1 %1034 }
 0xfa0   :  { %2234 = vmin.xlane.f32.xlu0 %v2230_v32  ;;  %v1017_v32 = vmul.f32 0.6931472, %v2973_v6 }
 0xfa1   :  { %v3961_v61 = vpop.xlane.xlu1 %2198 }
 0xfa4   :  { %2170 = vadd.xlane.f32.xlu0 %v2969_v43 }
 0xfa8   :  { %454 = vmin.xlane.f32.xlu0 %v448_v53  ;;  %v2977_v53 = vpop.eup %2976 }
 0xfa9   :  { %v1015_v58 = vmul.f32 0.6931472, %v2977_v53 }
 0xfab   :  { %v1022_v31 = vadd.f32 %v1015_v58, %v3774_v22 }
 0xfac   :  { %1658 = vmin.xlane.f32.xlu0 %v1652_v3  ;;  %v1601_v3 = vmul.f32 0.6931472, %v2975_v41 }
 0xfae   :  { %v1607_v23 = vadd.f32 %v1601_v3, %v3786_v50 }
 0xfb0   :  { %415 = vadd.xlane.f32.xlu0 %v408_v47  ;;  %v1623_v50 = vsub.f32 %v1607_v23, %v3947_v39 }
 0xfb2   :  { %v1627_v22 = vmul.f32 %v1623_v50, %v3987_v36 }
 0xfb4   :  { %1620 = vadd.xlane.f32.xlu0 %v1613_v38  ;;  %v2979_v38 = vpop.eup %2978  ;;  %v4070_v23 = vsel %vm425_vm0, %v1627_v22, 0.0 }
 0xfb5   :  { %v2981_v52 = vpop.eup %2980  ;;  %v394_v25 = vmul.f32 0.6931472, %v2979_v38 }
 0xfb6   :  { %v2983_v55 = vpop.eup %2982 }
 0xfb7   :  { %v2985_v4 = vpop.eup %2984  ;;  %v401_v39 = vadd.f32 %v394_v25, %v3770_v44 }
 0xfb8   :  { %456 = vmin.xlane.f32.xlu0 %v449_v12  ;;  %v402_v12 = vadd.f32 %v396_v7, %v3772_v20  ;;  %v3994_v20 = vld [vmem:[%s4346_s8 + $0x8] sm:$0xff]  ;;  %v2987_v62 = vpop.eup %2986  ;;  %v1019_v57 = vmul.f32 0.6931472, %v2985_v4 }
 0xfb9   :  { %vm463_vm2 = vcmp.gt.f32.partialorder %v3994_v20, 0.0  ;;  %v4157_v20 = vld [vmem:[%s4343_s7 + $0x18] sm:$0xff] }
 0xfba   :  { %v418_v1 = vsub.f32 %v402_v12, %v3943_v45  ;;  %v4001_v45 = vld [vmem:[%s4347_s9 + $0x8] sm:$0xff]  ;;  %v1024_v53 = vadd.f32 %v1019_v57, %v3794_v49 }
 0xfbb   :  { %vm459_vm3 = vcmp.eq.f32.partialorder %v3951_v8, %v4001_v45  ;;  %vm1079_vm4 = vcmp.eq.f32.partialorder %v3953_v13, %v4001_v45  ;;  %vm1663_vm7 = vcmp.eq.f32.partialorder %v3955_v0, %v4001_v45 }
 0xfbc   :  { %1660 = vmin.xlane.f32.xlu0 %v1653_v42  ;;  %v1023_v42 = vadd.f32 %v1017_v32, %v3776_v28  ;;  %v422_v9 = vmul.f32 %v418_v1, %v3987_v36  ;;  %vm4025_vm5 = vmand %vm459_vm3, %vm463_vm2  ;;  %v1040_v1 = vsub.f32 %v1024_v53, %v3957_v11  ;;  %v4086_v11 = vld [vmem:[%s4347_s9] sm:$0xff] }
 0xfbd   :  { %vm4044_vm6 = vmand %vm1079_vm4, %vm463_vm2 }
 0xfbe   :  { %v4021_v32 = vsel %vm425_vm0, %v422_v9, 0.0  ;;  %vm4102_vm12 = vmand %vm1663_vm7, %vm463_vm2 }
 0xfeb   :  { %v3965_v16 = vpop.xlane.xlu1 %2236 }
 0xfec   :  { %vm2243_vm10 = vcmp.eq.f32.partialorder %v3965_v16, %v4001_v45 }
 0xfed   :  { %vm4139_vm15 = vmand %vm2243_vm10, %vm463_vm2 }
 0xffb   :  { %v2173_v17 = vpop.xlane.xlu1 %2172 }
 0xffc   :  { %2988 = vlog2.f32 %v2173_v17  ;;  %v398_v17 = vmul.f32 0.6931472, %v2983_v55 }
 0xffd   :  { %2990 = vlog2.f32 %v1013_v34  ;;  %v1039_v34 = vsub.f32 %v1023_v42, %v3945_v27  ;;  %v1599_v27 = vmul.f32 0.6931472, %v2981_v52  ;;  %v4056_v52 = vld [vmem:[%s4347_s9 + $0x10] sm:$0xff] }
 0xffe   :  { %2992 = vlog2.f32 %v392_v14  ;;  %v403_v42 = vadd.f32 %v398_v17, %v3788_v51 }
 0xfff   :  { %v1043_v60 = vmul.f32 %v1039_v34, %v3987_v36  ;;  %v1606_v7 = vadd.f32 %v1599_v27, %v3778_v30  ;;  %v4067_v34 = vld [vmem:[%s4346_s8] sm:$0xff] }
0x1000   :  { %vm462_vm11 = vcmp.gt.f32.partialorder %v4067_v34, 0.0 }
0x1001   :  { %v1597_v15 = vpop.xlane.xlu0 %1596  ;;  %v1047_v12 = vsel %vm425_vm0, %v1043_v60, 0.0 }
0x1005   :  { %v3959_v5 = vpop.xlane.xlu0 %409  ;;  %v2177_v54 = vpop.xlane.xlu1 %2176 }
0x1006   :  { %v417_v44 = vsub.f32 %v401_v39, %v3959_v5  ;;  %v4051_v5 = vld [vmem:[%s4343_s7] sm:$0xff] }
0x1008   :  { %v421_v0 = vmul.f32 %v417_v44, %v4051_v5 }
0x1009   :  { %v3963_v63 = vpop.xlane.xlu0 %1030  ;;  %v2175_v29 = vpop.xlane.xlu1 %2174 }
0x100a   :  { %2994 = vlog2.f32 %v2175_v29  ;;  %v2989_v14 = vpop.eup %2988  ;;  %v1603_v29 = vmul.f32 0.6931472, %v2987_v62  ;;  %v3015_v62 = vmov 0.0  }
0x100b   :  { %2996 = vlog2.f32 %v1597_v15  ;;  %v2991_v6 = vpop.eup %2990  ;;  %v2181_v3 = vmul.f32 0.6931472, %v2989_v14  ;;  %v2299_v51 = vsel %vm4025_vm5, 1.0, %v3015_v62  ;;  %v2323_v27 = vsel %vm4044_vm6, 1.0, %v3015_v62 }
0x100c   :  { %2998 = vlog2.f32 %v2177_v54  ;;  %v1038_v54 = vsub.f32 %v1022_v31, %v3963_v63  ;;  %v2993_v41 = vpop.eup %2992  ;;  %v4034_v63 = vld [vmem:[%s4346_s8 + $0x10] sm:$0xff]  ;;  %v1021_v38 = vmul.f32 0.6931472, %v2991_v6  ;;  %v4060_v55 = vadd.f32 %v1603_v29, %v3801_v19 }
0x100d   :  { %v3967_v10 = vpop.xlane.xlu0 %1614  ;;  %v3977_v43 = vpop.xlane.xlu1 %1074  ;;  %v400_v58 = vmul.f32 0.6931472, %v2993_v41  ;;  %v4080_v19 = vld [vmem:[%s4343_s7 + $0x10] sm:$0xff]  ;;  %vm464_vm8 = vcmp.gt.f32.partialorder %v4034_v63, 0.0  ;;  %v2187_v50 = vadd.f32 %v2181_v3, %v3862_v26  ;;  %v4119_v6 = vsel %vm425_vm0, %v2299_v51, 0.0 }
0x100e   :  { %v1042_v4 = vmul.f32 %v1038_v54, %v4051_v5  ;;  %vm1080_vm9 = vcmp.eq.f32.partialorder %v3977_v43, %v4056_v52  ;;  %v1622_v57 = vsub.f32 %v1606_v7, %v3967_v10  ;;  %v1025_v9 = vadd.f32 %v1021_v38, %v3816_v24  ;;  %v4115_v24 = vld [vmem:[%s4346_s8 + $0x18] sm:$0xff] }
0x100f   :  { %v1044_v26 = vmul.f32 %v1040_v1, %v4080_v19  ;;  %v4122_v39 = vsel %vm425_vm0, %v2323_v27, 0.0  ;;  %vm4129_vm14 = vmand %vm1080_vm9, %vm464_vm8  ;;  %v404_v22 = vadd.f32 %v400_v58, %v3823_v48  ;;  %v2203_v8 = vsub.f32 %v2187_v50, %v3949_v56  ;;  %v4189_v1 = vld [vmem:[%s4347_s9 + $0x18] sm:$0xff] }
0x1010   :  { %v1046_v17 = vsel %vm425_vm0, %v1042_v4, 0.0  ;;  %v426_v43 = vsel %vm425_vm0, %v421_v0, 0.0  ;;  %v4151_v48 = vsel %vm4102_vm12, 1.0, %v3015_v62  ;;  %v1626_v16 = vmul.f32 %v1622_v57, %v4051_v5 }
0x1011   :  { %v3969_v18 = vpop.xlane.xlu0 %2194  ;;  %v4003_v46 = vpop.xlane.xlu1 %2238  ;;  %vm465_vm3 = vcmp.gt.f32.partialorder %v4115_v24, 0.0  ;;  %v1048_v45 = vadd.f32 %v1047_v12, %v1046_v17  ;;  %v2324_v44 = vsel %vm4129_vm14, 1.0, %v3015_v62  ;;  %v1049_v38 = vsel %vm425_vm0, %v1044_v26, 0.0 }
0x1012   :  { %v4175_v49 = vsel %vm4139_vm15, 1.0, %v3015_v62  ;;  %v428_v12 = vadd.f32 %v4021_v32, %v426_v43  ;;  %v4194_v51 = vsel %vm425_vm0, %v2324_v44, 0.0  ;;  %vm2244_vm6 = vcmp.eq.f32.partialorder %v4003_v46, %v4056_v52 }
0x1013   :  { %v1050_v27 = vadd.f32 %v1049_v38, %v1048_v45 }
0x1015   :  { %v3971_v33 = vpop.xlane.xlu0 %450  ;;  %v4036_v30 = vpop.xlane.xlu1 %1036 }
0x1016   :  { %vm458_vm13 = vcmp.eq.f32.partialorder %v3971_v33, %v4086_v11  ;;  %v1041_v53 = vsub.f32 %v1025_v9, %v4036_v30 }
0x1017   :  { %v2995_v25 = vpop.eup %2994  ;;  %vm466_vm2 = vmand %vm458_vm13, %vm462_vm11 }
0x1018   :  { %v2997_v60 = vpop.eup %2996  ;;  %v2183_v54 = vmul.f32 0.6931472, %v2995_v25  ;;  %v2298_v58 = vsel %vm466_vm2, 1.0, %v3015_v62 }
0x1019   :  { %v3973_v35 = vpop.xlane.xlu0 %1070  ;;  %v4110_v29 = vpop.xlane.xlu1 %2200  ;;  %v1605_v3 = vmul.f32 0.6931472, %v2997_v60  ;;  %v478_v26 = vsel %vm425_vm0, %v2298_v58, 0.0 }
0x101a   :  { %vm1078_vm1 = vcmp.eq.f32.partialorder %v3973_v35, %v4086_v11  ;;  %v1630_v35 = vsel %vm425_vm0, %v1626_v16, 0.0  ;;  %v480_v16 = vadd.f32 %v4119_v6, %v478_v26 }
0x101b   :  { %vm1082_vm4 = vmand %vm1078_vm1, %vm462_vm11  ;;  %v1609_v57 = vadd.f32 %v1605_v3, %v3873_v21 }
0x101c   :  { %v2322_v50 = vsel %vm1082_vm4, 1.0, %v3015_v62 }
0x101d   :  { %v3975_v59 = vpop.xlane.xlu0 %1654  ;;  %v1077_v4 = vpop.xlane.xlu1 %1076 }
0x101e   :  { %vm1081_vm7 = vcmp.eq.f32.partialorder %v1077_v4, %v4189_v1  ;;  %vm1662_vm10 = vcmp.eq.f32.partialorder %v3975_v59, %v4086_v11 }
0x101f   :  { %vm4222_vm13 = vmand %vm1081_vm7, %vm465_vm3 }
0x1020   :  { %vm4235_vm14 = vmand %vm1662_vm10, %vm462_vm11  ;;  %v2325_v44 = vsel %vm4222_vm13, 1.0, %v3015_v62 }
0x1021   :  { %v3979_v47 = vpop.xlane.xlu0 %413 }
0x1022   :  { %v419_v10 = vsub.f32 %v403_v42, %v3979_v47  ;;  %v2999_v47 = vpop.eup %2998  ;;  %v2188_v42 = vadd.f32 %v2183_v54, %v3871_v37  ;;  %v2207_v37 = vmul.f32 %v2203_v8, %v3987_v36 }
0x1023   :  { %v2185_v33 = vmul.f32 0.6931472, %v2999_v47 }
0x1024   :  { %v423_v30 = vmul.f32 %v419_v10, %v4080_v19  ;;  %v2204_v36 = vsub.f32 %v2188_v42, %v3961_v61 }
0x1025   :  { %v3996_v28 = vpop.xlane.xlu0 %1618  ;;  %v2189_v17 = vadd.f32 %v2185_v33, %v3877_v2 }
0x1026   :  { %v1624_v32 = vsub.f32 %v4060_v55, %v3996_v28  ;;  %v429_v9 = vsel %vm425_vm0, %v423_v30, 0.0  ;;  %v1094_v55 = vsel %vm425_vm0, %v2322_v50, 0.0  ;;  %v2208_v8 = vmul.f32 %v2204_v36, %v4080_v19 }
0x1027   :  { %v430_v60 = vadd.f32 %v429_v9, %v428_v12  ;;  %v2205_v7 = vsub.f32 %v2189_v17, %v4110_v29  ;;  %v1096_v45 = vadd.f32 %v4122_v39, %v1094_v55  ;;  %v2346_v30 = vsel %vm4235_vm14, 1.0, %v3015_v62 }
0x1028   :  { %v1628_v10 = vmul.f32 %v1624_v32, %v4080_v19  ;;  %v2213_v38 = vsel %vm425_vm0, %v2208_v8, 0.0  ;;  %v1099_v12 = vsel %vm425_vm0, %v2325_v44, 0.0  ;;  %v1678_v50 = vsel %vm425_vm0, %v2346_v30, 0.0 }
0x1029   :  { %v4012_v15 = vpop.xlane.xlu0 %2234  ;;  %v2209_v39 = vmul.f32 %v2205_v7, %v4157_v20 }
0x102a   :  { %vm2242_vm12 = vcmp.eq.f32.partialorder %v4012_v15, %v4086_v11  ;;  %v1632_v11 = vadd.f32 %v4070_v23, %v1630_v35  ;;  %v1633_v23 = vsel %vm425_vm0, %v1628_v10, 0.0 }
0x102b   :  { %vm4244_vm1 = vmand %vm2242_vm12, %vm462_vm11 }
0x102d   :  { %v2171_v13 = vpop.xlane.xlu0 %2170 }
0x102e   :  { %3000 = vlog2.f32 %v2171_v13  ;;  %v1045_v13 = vmul.f32 %v1041_v53, %v4157_v20  ;;  %v2211_v53 = vsel %vm425_vm0, %v2207_v37, 0.0  ;;  %v1634_v37 = vadd.f32 %v1633_v23, %v1632_v11 }
0x1030   :  { %v1051_v28 = vsel %vm425_vm0, %v1045_v13, 0.0  ;;  %v2241_v13 = vpop.xlane.xlu1 %2240 }
0x1031   :  { %v455_v31 = vpop.xlane.xlu0 %454  ;;  %v1052_v3 = vadd.f32 %v1051_v28, %v1050_v27  ;;  %v1098_v27 = vadd.f32 %v4194_v51, %v1096_v45  ;;  %v2259_v51 = vsel %vm425_vm0, %v4175_v49, 0.0 }
0x1032   :  { %vm460_vm5 = vcmp.eq.f32.partialorder %v455_v31, %v4056_v52  ;;  %v2866_v31 = vpop.f32.mrf.mxu0 }
0x1033   :  { %vm468_vm9 = vmand %vm460_vm5, %vm464_vm8  ;;  %v1100_v17 = vadd.f32 %v1099_v12, %v1098_v27 }
0x1034   :  { %v2300_v41 = vsel %vm468_vm9, 1.0, %v3015_v62  ;;  %vm2248_vm5 = vmand %vm2244_vm6, %vm464_vm8  ;;  %v2135_v24 = vpop.f32.mrf.mxu0 }
0x1035   :  { %v4165_v56 = vpop.xlane.xlu0 %1658  ;;  %v481_v19 = vsel %vm425_vm0, %v2300_v41, 0.0  ;;  %v2372_v9 = vsel %vm2248_vm5, 1.0, %v3015_v62 }
0x1036   :  { %vm1664_vm15 = vcmp.eq.f32.partialorder %v4165_v56, %v4056_v52  ;;  %v2370_v56 = vsel %vm4244_vm1, 1.0, %v3015_v62  ;;  %v482_v33 = vadd.f32 %v481_v19, %v480_v16  ;;  %v1679_v52 = vsel %vm425_vm0, %v4151_v48, 0.0 }
0x1037   :  { %vm4263_vm11 = vmand %vm1664_vm15, %vm464_vm8  ;;  %vm2245_vm8 = vcmp.eq.f32.partialorder %v2241_v13, %v4189_v1  ;;  %v1680_v36 = vadd.f32 %v1679_v52, %v1678_v50  ;;  %v2261_v49 = vsel %vm425_vm0, %v2372_v9, 0.0 }
0x1038   :  { %v2348_v32 = vsel %vm4263_vm11, 1.0, %v3015_v62  ;;  %vm2249_vm6 = vmand %vm2245_vm8, %vm465_vm3 }
0x1039   :  { %v416_v25 = vpop.xlane.xlu0 %415  ;;  %v2373_v28 = vsel %vm2249_vm6, 1.0, %v3015_v62 }
0x103a   :  { %v420_v0 = vsub.f32 %v404_v22, %v416_v25 }
0x103b   :  { %v3001_v14 = vpop.eup %3000 }
0x103c   :  { %v2179_v21 = vmul.f32 0.6931472, %v3001_v14  ;;  %v424_v61 = vmul.f32 %v420_v0, %v4157_v20  ;;  %v2258_v0 = vsel %vm425_vm0, %v2370_v56, 0.0  ;;  %v1681_v14 = vsel %vm425_vm0, %v2348_v32, 0.0 }
0x103d   :  { %v1621_v2 = vpop.xlane.xlu0 %1620  ;;  %v2260_v26 = vadd.f32 %v2259_v51, %v2258_v0  ;;  %v1682_v48 = vadd.f32 %v1681_v14, %v1680_v36 }
0x103e   :  { %v2186_v54 = vadd.f32 %v2179_v21, %v3868_v40  ;;  %v1625_v22 = vsub.f32 %v1609_v57, %v1621_v2  ;;  %v431_v47 = vsel %vm425_vm0, %v424_v61, 0.0  ;;  %v2215_v21 = vsel %vm425_vm0, %v2209_v39, 0.0 }
0x103f   :  { %v432_v40 = vadd.f32 %v431_v47, %v430_v60  ;;  %v2262_v10 = vadd.f32 %v2261_v49, %v2260_v26  ;;  %v2263_v2 = vsel %vm425_vm0, %v2373_v28, 0.0 }
0x1040   :  { %v2202_v29 = vsub.f32 %v2186_v54, %v3969_v18  ;;  %v1629_v59 = vmul.f32 %v1625_v22, %v4157_v20  ;;  %v2869_v54 = vpop.f32.mrf.mxu0 }
0x1041   :  { %433 = vadd.xlane.f32.xlu0 %v432_v40  ;;  %v457_v34 = vpop.xlane.xlu0 %456  ;;  %v2264_v60 = vadd.f32 %v2263_v2, %v2262_v10 }
0x1042   :  { %vm461_vm2 = vcmp.eq.f32.partialorder %v457_v34, %v4189_v1  ;;  %v2206_v6 = vmul.f32 %v2202_v29, %v4051_v5  ;;  %v1635_v5 = vsel %vm425_vm0, %v1629_v59, 0.0  ;;  %v2143_v41 = vpop.f32.mrf.mxu0 }
0x1043   :  { %vm469_vm4 = vmand %vm461_vm2, %vm465_vm3  ;;  %v1636_v63 = vadd.f32 %v1635_v5, %v1634_v37 }
0x1044   :  { %v2301_v42 = vsel %vm469_vm4, 1.0, %v3015_v62  ;;  %v2210_v20 = vsel %vm425_vm0, %v2206_v6, 0.0 }
0x1045   :  { %v483_v58 = vsel %vm425_vm0, %v2301_v42, 0.0  ;;  %1053 = vadd.xlane.f32.xlu0 %v1052_v3  ;;  %v1661_v4 = vpop.xlane.xlu0 %1660  ;;  %v2212_v35 = vadd.f32 %v2211_v53, %v2210_v20 }
0x1046   :  { %vm1665_vm7 = vcmp.eq.f32.partialorder %v1661_v4, %v4189_v1  ;;  %v484_v25 = vadd.f32 %v483_v58, %v482_v33 }
0x1047   :  { %vm1669_vm9 = vmand %vm1665_vm7, %vm465_vm3  ;;  %v2214_v57 = vadd.f32 %v2213_v38, %v2212_v35 }
0x1048   :  { %v2349_v46 = vsel %vm1669_vm9, 1.0, %v3015_v62  ;;  %485 = vadd.xlane.f32.xlu1 %v484_v25 }
0x1049   :  { %1637 = vadd.xlane.f32.xlu0 %v1636_v63  ;;  %v1683_v1 = vsel %vm425_vm0, %v2349_v46, 0.0  ;;  %v2216_v61 = vadd.f32 %v2215_v21, %v2214_v57 }
0x104a   :  { %v1684_v55 = vadd.f32 %v1683_v1, %v1682_v48 }
0x104c   :  { %1101 = vadd.xlane.f32.xlu1 %v1100_v17 }
0x104d   :  { %2217 = vadd.xlane.f32.xlu0 %v2216_v61 }
0x1050   :  { %1685 = vadd.xlane.f32.xlu1 %v1684_v55 }
0x1054   :  { %2265 = vadd.xlane.f32.xlu1 %v2264_v60 }
0x10ca   :  { %v434_v22 = vpop.xlane.xlu0 %433 }
0x10cb   :  { %v435_v47 = vrot.slane %v434_v22, 4 }
0x10cd   :  { %v436_v7 = vadd.f32 %v435_v47, %v434_v22 }
0x10ce   :  { %v1054_v15 = vpop.xlane.xlu0 %1053 }
0x10cf   :  { %v437_v40 = vrot.slane %v436_v7, 2  ;;  %v1055_v8 = vrot.slane %v1054_v15, 4 }
0x10d1   :  { %v1056_v43 = vadd.f32 %v1055_v8, %v1054_v15  ;;  %v486_v29 = vpop.xlane.xlu1 %485  ;;  %v438_v62 = vadd.f32 %v437_v40, %v436_v7 }
0x10d2   :  { %v487_v59 = vrot.slane %v486_v29, 4  ;;  %v1638_v11 = vpop.xlane.xlu0 %1637 }
0x10d3   :  { %v1057_v53 = vrot.slane %v1056_v43, 2  ;;  %v1639_v16 = vrot.slane %v1638_v11, 4  ;;  %v439_v45 = vrot.slane %v438_v62, 1 }
0x10d4   :  { %v488_v19 = vadd.f32 %v487_v59, %v486_v29 }
0x10d5   :  { %v1640_v34 = vadd.f32 %v1639_v16, %v1638_v11  ;;  %v1102_v3 = vpop.xlane.xlu1 %1101  ;;  %v440_v44 = vadd.f32 %v439_v45, %v438_v62  ;;  %v1058_v18 = vadd.f32 %v1057_v53, %v1056_v43 }
0x10d6   :  { %v489_v23 = vrot.slane %v488_v19, 2  ;;  %v1103_v6 = vrot.slane %v1102_v3, 4  ;;  %v2218_v39 = vpop.xlane.xlu0 %2217 }
0x10d7   :  { %v1641_v30 = vrot.slane %v1640_v34, 2  ;;  %v2219_v56 = vrot.slane %v2218_v39, 4  ;;  %2870 = vpush %v440_v44  ;;  %v1059_v20 = vrot.slane %v1058_v18, 1 }
0x10d8   :  { %v1104_v38 = vadd.f32 %v1103_v6, %v1102_v3  ;;  %v490_v33 = vadd.f32 %v489_v23, %v488_v19 }
0x10d9   :  { %v2220_v42 = vadd.f32 %v2219_v56, %v2218_v39  ;;  %v1686_v5 = vpop.xlane.xlu1 %1685  ;;  %v1642_v12 = vadd.f32 %v1641_v30, %v1640_v34  ;;  %v1060_v0 = vadd.f32 %v1059_v20, %v1058_v18 }
0x10da   :  { %v1105_v13 = vrot.slane %v1104_v38, 2  ;;  %v1687_v58 = vrot.slane %v1686_v5, 4  ;;  %v491_v4 = vrot.slane %v490_v33, 1 }
0x10db   :  { %v2221_v37 = vrot.slane %v2220_v42, 2  ;;  %v1643_v63 = vrot.slane %v1642_v12, 1 }
0x10dc   :  { %v1688_v35 = vadd.f32 %v1687_v58, %v1686_v5  ;;  %v492_v32 = vadd.f32 %v491_v4, %v490_v33  ;;  %v1106_v25 = vadd.f32 %v1105_v13, %v1104_v38 }
0x10dd   :  { %v2222_v27 = vadd.f32 %v2221_v37, %v2220_v42  ;;  %v2266_v50 = vpop.xlane.xlu1 %2265  ;;  %v1644_v36 = vadd.f32 %v1643_v63, %v1642_v12 }
0x10de   :  { %v1689_v57 = vrot.slane %v1688_v35, 2  ;;  %v2267_v46 = vrot.slane %v2266_v50, 4  ;;  %2872 = vpush %v492_v32  ;;  %v1107_v52 = vrot.slane %v1106_v25, 1 }
0x10df   :  { %2874 = vpush %v1060_v0  ;;  %v2223_v26 = vrot.slane %v2222_v27, 1 }
0x10e0   :  { %v2268_v51 = vadd.f32 %v2267_v46, %v2266_v50  ;;  %v1108_v9 = vadd.f32 %v1107_v52, %v1106_v25  ;;  %v1690_v14 = vadd.f32 %v1689_v57, %v1688_v35 }
0x10e1   :  { %v2224_v48 = vadd.f32 %v2223_v26, %v2222_v27 }
0x10e2   :  { %v2269_v17 = vrot.slane %v2268_v51, 2  ;;  %2876 = vpush %v1108_v9  ;;  %v1691_v21 = vrot.slane %v1690_v14, 1 }
0x10e3   :  { %2878 = vpush %v1644_v36 }
0x10e4   :  { %v2270_v1 = vadd.f32 %v2269_v17, %v2268_v51  ;;  %v1692_v61 = vadd.f32 %v1691_v21, %v1690_v14 }
0x10e6   :  { %2880 = vpush %v1692_v61  ;;  %v2271_v49 = vrot.slane %v2270_v1, 1 }
0x10e7   :  { %2882 = vpush %v2224_v48 }
0x10e8   :  { %v2272_v28 = vadd.f32 %v2271_v49, %v2270_v1 }
0x10ea   :  { %2884 = vpush %v2272_v28 }
0x1108   :  { %s2871_s9 = spop %2870 }
0x1109   :  { %v740_v55 = vstv %s2871_s9 }
0x110a   :  { %741 = vst [vmem:[%s4348_s10] sm:$0x1] %v740_v55 }
0x110f   :  { %s2873_s11 = spop %2872 }
0x1110   :  { %v742_v10 = vstv %s2873_s11  ;;  %s2875_s12 = spop %2874 }
0x1111   :  { %743 = vst [vmem:[%s4348_s10 + $0x4] sm:$0x1] %v742_v10  ;;  %v1324_v2 = vstv %s2875_s12 }
0x1112   :  { %1325 = vst [vmem:[%s4348_s10 + $0x1] sm:$0x1] %v1324_v2 }
0x1113   :  { %s2877_s3 = spop %2876 }
0x1114   :  { %v1326_v60 = vstv %s2877_s3  ;;  %s2879_s16 = spop %2878 }
0x1115   :  { %1327 = vst [vmem:[%s4348_s10 + $0x5] sm:$0x1] %v1326_v60  ;;  %v1908_v31 = vstv %s2879_s16 }
0x1116   :  { %1909 = vst [vmem:[%s4348_s10 + $0x2] sm:$0x1] %v1908_v31 }
0x1117   :  { %s2881_s21 = spop %2880 }
0x1118   :  { %v1910_v24 = vstv %s2881_s21  ;;  %s2883_s22 = spop %2882 }
0x1119   :  { %1911 = vst [vmem:[%s4348_s10 + $0x6] sm:$0x1] %v1910_v24  ;;  %v2274_v54 = vstv %s2883_s22 }
0x111a   :  { %2275 = vst [vmem:[%s4348_s10 + $0x3] sm:$0x1] %v2274_v54 }
0x111b   :  { %s2885_s26 = spop %2884 }
0x111c   :  { %v2276_v41 = vstv %s2885_s26 }
0x111d   :  { %2277 = vst [vmem:[%s4348_s10 + $0x7] sm:$0x1] %v2276_v41 }

</bundles_post_ra>
